<compile_context>
chip_gen: v6e
topology: v6e:2x2x1
jax: 0.10.0
libtpu: 0.0.40
codegen_flags: <defaults>
</compile_context>

<pallas_src>
import functools

import jax
import jax.numpy as jnp
from jax import lax
from jax.experimental import pallas as pl
from jax.experimental.pallas import tpu as pltpu


def _cross_attn_kernel(tgt_ref, qpos_ref, mem_ref, kpos_ref, w_ref, vec_ref,
                       out_ref, q_scr, m_scr, l_scr, acc_scr,
                       *, nhead, compute_dtype, exp_in_bf16, exact_recip):
    f32 = jnp.float32
    cdt = compute_dtype
    bb, tq, d = tgt_ref.shape
    _, bk, _ = mem_ref.shape
    hd = d // nhead
    nq = bb * tq
    nk = bb * bk

    k_step = pl.program_id(1)
    last_k = pl.num_programs(1) - 1
    vecs = vec_ref[...]                                      # (8, d) f32

    def split_heads(x2d, rows):
        # (bb*rows, d) -> (nhead*bb, rows, hd); group-major order (head, batch).
        # Static lane slices + major-dim stack/reshape (sublane-aligned: rows%8==0
        # or bb==1, enforced by the wrapper).
        parts = [x2d[:, h * hd:(h + 1) * hd] for h in range(nhead)]
        return jnp.stack(parts, axis=0).reshape(nhead * bb, rows, hd)

    # ---- once per batch block: full-width Q projection + accumulator init --
    @pl.when(k_step == 0)
    def _():
        q_in = (tgt_ref[...] + qpos_ref[...]).astype(cdt).reshape(nq, d)
        # 1/sqrt(hd) scale is pre-folded into w_ref[0] / vecs[0].
        q2 = jnp.dot(q_in, w_ref[0], preferred_element_type=f32) + vecs[0:1, :]
        q_scr[...] = split_heads(q2.astype(cdt), tq)
        m_scr[...] = jnp.full(m_scr.shape, -jnp.inf, dtype=m_scr.dtype)
        l_scr[...] = jnp.zeros(l_scr.shape, dtype=l_scr.dtype)
        acc_scr[...] = jnp.zeros(acc_scr.shape, dtype=acc_scr.dtype)

    # ---- per Tk block: full-width K/V projections + online-softmax update --
    k_in = (mem_ref[...] + kpos_ref[...]).astype(cdt).reshape(nk, d)
    v_in = mem_ref[...].astype(cdt).reshape(nk, d)
    k2 = jnp.dot(k_in, w_ref[1], preferred_element_type=f32) + vecs[1:2, :]
    v2 = jnp.dot(v_in, w_ref[2], preferred_element_type=f32) + vecs[2:3, :]
    kg = split_heads(k2.astype(cdt), bk)                     # (G, bk, hd)
    vg = split_heads(v2.astype(cdt), bk)

    dn_qk = (((2,), (2,)), ((0,), (0,)))    # (g,q,e)x(g,k,e) -> (g,q,k)
    dn_pv = (((2,), (1,)), ((0,), (0,)))    # (g,q,k)x(g,k,e) -> (g,q,e)
    s = lax.dot_general(q_scr[...], kg, dn_qk, preferred_element_type=f32)

    m_prev = m_scr[...]
    m_new = jnp.maximum(m_prev, jnp.max(s, axis=-1, keepdims=True))
    alpha = jnp.exp(m_prev - m_new)
    z = s - m_new
    # For small hd on the bf16 path the single EUP (exp) is the likely binding
    # slot; bf16 exp ~doubles its throughput. Stats / accumulators stay f32.
    p = jnp.exp(z.astype(jnp.bfloat16)) if exp_in_bf16 else jnp.exp(z)
    l_scr[...] = alpha * l_scr[...] + jnp.sum(p.astype(f32), axis=-1, keepdims=True)
    acc_scr[...] = alpha * acc_scr[...] + lax.dot_general(
        p.astype(cdt), vg, dn_pv, preferred_element_type=f32)
    m_scr[...] = m_new

    # ---- final Tk block: normalize, out-proj (K = D), residual + LayerNorm -
    @pl.when(k_step == last_k)
    def _():
        l = l_scr[...]
        inv_l = (1.0 / l) if exact_recip else pl.reciprocal(l, approx=True)
        ctx = (acc_scr[...] * inv_l).astype(cdt)             # (G, tq, hd)
        # concat-heads: (nhead*bb, tq, hd) -> (nq, d) with head h at lanes
        # [h*hd, (h+1)*hd)  ==  torch's concat-heads layout, so Wo^T applies.
        ctx_h = ctx.reshape(nhead, nq, hd)
        ctx2d = jnp.concatenate([ctx_h[h] for h in range(nhead)], axis=-1)
        attn = jnp.dot(ctx2d, w_ref[3], preferred_element_type=f32) + vecs[3:4, :]
        # dropout(p=0) == identity; residual + LayerNorm (eps=1e-5) in f32.
        x = tgt_ref[...].astype(f32).reshape(nq, d) + attn
        mean = jnp.mean(x, axis=-1, keepdims=True)
        xc = x - mean
        var = jnp.mean(xc * xc, axis=-1, keepdims=True)
        y = xc * lax.rsqrt(var + 1e-5)
        y = y * vecs[4:5, :] + vecs[5:6, :]
        out_ref[...] = y.reshape(bb, tq, d).astype(out_ref.dtype)


# --------------------------- block-size selection ----------------------------

def _vmem_capacity_bytes():
    try:
        return int(pltpu.get_tpu_info().vmem_capacity_bytes)
    except Exception:
        return 128 * 1024 * 1024          # v5e / v6e default


def _round_up(x, m):
    return -(-x // m) * m


def _estimate_vmem_bytes(bb, bk, tq, d, nhead, act_bytes, out_bytes):
    """Rough per-step VMEM footprint: double-buffered pipelined blocks +
    persistent scratch + transient in-kernel intermediates."""
    hd = d // nhead
    G = bb * nhead
    sub = lambda r: _round_up(max(r, 1), 8)
    lane = lambda c: _round_up(max(c, 1), 128)
    blocks = (2 * act_bytes * d * (2 * bb * sub(tq) + 2 * bb * sub(bk))  # tgt/qpos/mem/pos
              + 2 * out_bytes * d * bb * sub(tq)                         # out block
              + 2 * (4 * d * d * act_bytes + 8 * d * 4))                 # weights + vecs
    scratch = (G * sub(tq) * lane(hd) * (act_bytes + 4)                  # q_scr + acc
               + 2 * G * sub(tq) * 128 * 4)                              # m, l
    inter = (2 * G * sub(tq) * lane(bk) * 4                              # s, p
             + 4 * bb * sub(bk) * d * 4                                  # K/V proj + head views
             + 3 * bb * sub(tq) * d * 4)                                 # q/ctx/x temporaries
    return blocks + scratch + inter


def _pick_block_k(Tk, max_block=512):
    """Largest divisor of Tk that is a multiple of 8 and <= max_block."""
    cands = [d for d in range(8, min(Tk, max_block) + 1, 8) if Tk % d == 0]
    if Tk <= max_block:
        cands.append(Tk)
    return max(cands) if cands else Tk


def _pick_block_b(B, Tq, block_k, D, nhead, act_bytes, out_bytes, budget):
    """Largest batch block fitting the VMEM budget; prefers block_b*Tq that is a
    multiple of 128 (full MXU row tiles on the D x D projections)."""
    if B > 1 and (Tq % 8 != 0 or block_k % 8 != 0):
        return 1
    fits = [bb for bb in range(1, B + 1)
            if B % bb == 0
            and _estimate_vmem_bytes(bb, block_k, Tq, D, nhead,
                                     act_bytes, out_bytes) <= budget]
    if not fits:
        return 1
    aligned = [bb for bb in fits if (bb * Tq) % 128 == 0]
    if aligned and max(aligned) * Tq >= 128:
        return max(aligned)
    return max(fits)


# --------------------------------- wrapper -----------------------------------

def cross_attention_layer(tgt, memory, params, *, nhead, pos=None,
                          query_pos=None, block_b=None, block_k=None,
                          compute_dtype=jnp.bfloat16):
    B, Tq, D = tgt.shape
    Bm, Tk, Dm = memory.shape
    assert Bm == B and Dm == D
    assert D % nhead == 0, "nhead must divide d_model (nn.MultiheadAttention requirement)"
    hd = D // nhead
    f32 = jnp.float32
    cdt = jnp.dtype(compute_dtype)

    if query_pos is None:
        query_pos = jnp.zeros_like(tgt)
    if pos is None:
        pos = jnp.zeros_like(memory)

    act_bytes = cdt.itemsize
    out_bytes = jnp.dtype(tgt.dtype).itemsize

    # Generation-aware VMEM budget: ~100 MiB on 128 MiB chips (v5e/v6e),
    # ~50 MiB on 64 MiB chips (v7x).
    vmem_cap = _vmem_capacity_bytes()
    vmem_limit = max(32 * 1024 * 1024, int(vmem_cap * 0.78))
    budget = int(vmem_limit * 0.85)

    if block_k is None:
        block_k = _pick_block_k(Tk)
    assert Tk % block_k == 0
    if block_b is None:
        block_b = _pick_block_b(B, Tq, block_k, D, nhead, act_bytes, out_bytes, budget)
    assert B % block_b == 0
    if block_b > 1 and (Tq % 8 != 0 or block_k % 8 != 0):
        raise ValueError(
            "block_b > 1 requires Tq and block_k to be multiples of 8 so the "
            "(head, batch*seq) -> (head*batch, seq) regrouping reshape stays "
            "sublane-aligned")

    scale = 1.0 / float(hd) ** 0.5
    # Projection matrices shipped pre-transposed, full width (D, D): row index
    # is the input feature, so x @ w == x @ W^T of the torch layout. The
    # 1/sqrt(hd) softmax scale is folded into Wq / bq (zero in-kernel cost).
    w_all = jnp.stack([
        params["wq"].astype(f32).T * scale,
        params["wk"].astype(f32).T,
        params["wv"].astype(f32).T,
        params["wo"].astype(f32).T,
    ], axis=0).astype(cdt)                                   # (4, D, D)

    # All six (D,) vectors packed into one lane-dense (8, D) f32 block.
    vecs = jnp.zeros((8, D), f32)
    vecs = vecs.at[0].set(params["bq"].astype(f32) * scale)
    vecs = vecs.at[1].set(params["bk"].astype(f32))
    vecs = vecs.at[2].set(params["bv"].astype(f32))
    vecs = vecs.at[3].set(params["bo"].astype(f32))
    vecs = vecs.at[4].set(params["lnw"].astype(f32))
    vecs = vecs.at[5].set(params["lnb"].astype(f32))

    # Activations shipped in the compute dtype (halves HBM->VMEM DMA on bf16).
    tgt_c = tgt.astype(cdt)
    mem_c = memory.astype(cdt)
    qpos_c = query_pos.astype(cdt)
    kpos_c = pos.astype(cdt)

    G = block_b * nhead
    exp_in_bf16 = (cdt == jnp.dtype(jnp.bfloat16)) and hd <= 64
    exact_recip = (cdt == jnp.dtype(jnp.float32))

    kernel = functools.partial(_cross_attn_kernel, nhead=nhead, compute_dtype=cdt,
                               exp_in_bf16=exp_in_bf16, exact_recip=exact_recip)

    def nbytes(a):
        return a.size * a.dtype.itemsize

    cost = pl.CostEstimate(
        flops=int(4 * B * D * (D * (Tq + Tk) + Tq * Tk)),
        transcendentals=int(B * nhead * Tq * (Tk + Tk // block_k + 1)),
        bytes_accessed=int(sum(nbytes(a) for a in
                               (tgt_c, mem_c, qpos_c, kpos_c, w_all, vecs))
                           + nbytes(tgt)))

    grid = (B // block_b, Tk // block_k)
    return pl.pallas_call(
        kernel,
        out_shape=jax.ShapeDtypeStruct((B, Tq, D), tgt.dtype),
        grid_spec=pltpu.PrefetchScalarGridSpec(
            num_scalar_prefetch=0,
            grid=grid,
            in_specs=[
                pl.BlockSpec((block_b, Tq, D), lambda i, k: (i, 0, 0)),       # tgt
                pl.BlockSpec((block_b, Tq, D), lambda i, k: (i, 0, 0)),       # query_pos
                pl.BlockSpec((block_b, block_k, D), lambda i, k: (i, k, 0)),  # memory
                pl.BlockSpec((block_b, block_k, D), lambda i, k: (i, k, 0)),  # pos
                pl.BlockSpec((4, D, D), lambda i, k: (0, 0, 0)),              # WqT/WkT/WvT/WoT
                pl.BlockSpec((8, D), lambda i, k: (0, 0)),                    # bq/bk/bv/bo/lnw/lnb
            ],
            out_specs=pl.BlockSpec((block_b, Tq, D), lambda i, k: (i, 0, 0)),
            scratch_shapes=[
                pltpu.VMEM((G, Tq, hd), cdt),          # projected Q (resident over Tk)
                pltpu.VMEM((G, Tq, 1), jnp.float32),   # online-softmax running max
                pltpu.VMEM((G, Tq, 1), jnp.float32),   # online-softmax running sum
                pltpu.VMEM((G, Tq, hd), jnp.float32),  # un-normalized context accumulator
            ]),
        compiler_params=pltpu.CompilerParams(
            dimension_semantics=("parallel", "arbitrary"),
            vmem_limit_bytes=vmem_limit),
        cost_estimate=cost,
    )(tgt_c, qpos_c, mem_c, kpos_c, w_all, vecs)


# ------------------------------- reference -----------------------------------

def reference(tgt, memory, params, *, nhead, pos, query_pos):
    """Pure-JAX reference of forward_post (dropout p=0), f32 matmuls."""
    with jax.default_matmul_precision("float32"):
        q_in = tgt + query_pos
        k_in = memory + pos
        v_in = memory
        q = q_in @ params["wq"].T + params["bq"]
        k = k_in @ params["wk"].T + params["bk"]
        v = v_in @ params["wv"].T + params["bv"]
        B, Tq, D = q.shape
        Tk = k.shape[1]
        hd = D // nhead
        qh = q.reshape(B, Tq, nhead, hd).transpose(0, 2, 1, 3)
        kh = k.reshape(B, Tk, nhead, hd).transpose(0, 2, 1, 3)
        vh = v.reshape(B, Tk, nhead, hd).transpose(0, 2, 1, 3)
        s = jnp.einsum("bhqd,bhkd->bhqk", qh, kh) / jnp.sqrt(jnp.float32(hd))
        a = jax.nn.softmax(s, axis=-1)
        ctx = jnp.einsum("bhqk,bhkd->bhqd", a, vh)
        ctx = ctx.transpose(0, 2, 1, 3).reshape(B, Tq, D)
        attn_out = ctx @ params["wo"].T + params["bo"]
        x = tgt + attn_out
        mean = x.mean(-1, keepdims=True)
        var = ((x - mean) ** 2).mean(-1, keepdims=True)
        y = (x - mean) / jnp.sqrt(var + 1e-5)
        return y * params["lnw"] + params["lnb"]


def _xavier_uniform(key, shape):
    fan_out, fan_in = shape
    bound = (6.0 / (fan_in + fan_out)) ** 0.5
    return jax.random.uniform(key, shape, jnp.float32, -bound, bound)


def init_params(key, d_model):
    # Mirrors the module's _reset_parameters: xavier_uniform on >1-dim params
    # (in_proj_weight (3D,D), out_proj.weight); biases zero; LN weight=1, b=0.
    k_in, k_out = jax.random.split(key)
    in_proj = _xavier_uniform(k_in, (3 * d_model, d_model))
    wq, wk, wv = jnp.split(in_proj, 3, axis=0)
    wo = _xavier_uniform(k_out, (d_model, d_model))
    zeros = jnp.zeros((d_model,), jnp.float32)
    return dict(
        wq=wq, wk=wk, wv=wv,
        bq=zeros, bk=zeros, bv=zeros,
        wo=wo, bo=zeros,
        lnw=jnp.ones((d_model,), jnp.float32),
        lnb=zeros,
    )


if __name__ == "__main__":
    B, Tq, Tk, D, H = 4, 8, 16, 32, 4

    key = jax.random.PRNGKey(0)
    k_tgt, k_mem, k_qp, k_p, k_par = jax.random.split(key, 5)
    tgt = jax.random.normal(k_tgt, (B, Tq, D), jnp.float32)
    memory = jax.random.normal(k_mem, (B, Tk, D), jnp.float32)
    query_pos = jax.random.normal(k_qp, (B, Tq, D), jnp.float32)
    pos = jax.random.normal(k_p, (B, Tk, D), jnp.float32)
    params = init_params(k_par, D)

    # Default path: bf16 activations / MXU inputs, f32 softmax stats & LayerNorm.
    out_bf16 = cross_attention_layer(tgt, memory, params, nhead=H,
                                     pos=pos, query_pos=query_pos)
    # Full-f32 compute path (same kernel, compute_dtype=f32, exact divide).
    out_f32 = cross_attention_layer(tgt, memory, params, nhead=H,
                                    pos=pos, query_pos=query_pos,
                                    compute_dtype=jnp.float32)
    out_bf16, out_f32 = jax.block_until_ready((out_bf16, out_f32))

    ref = reference(tgt, memory, params, nhead=H, pos=pos, query_pos=query_pos)
    assert out_bf16.shape == (B, Tq, D) and out_f32.shape == (B, Tq, D)
    err_f32 = float(jnp.max(jnp.abs(out_f32 - ref)))
    err_b16 = float(jnp.max(jnp.abs(out_bf16 - ref)))
    assert jnp.allclose(out_f32, ref, rtol=3e-2, atol=3e-2), err_f32
    assert jnp.allclose(out_bf16, ref, rtol=1e-1, atol=1e-1), err_b16

    print("KERNEL_OK")
</pallas_src>

<mosaic_0001>
module attributes {stable_mosaic.version = 11 : i64} {
  func.func @_cross_attn_kernel(%arg0: i32, %arg1: i32, %arg2: memref<4x8x32xbf16, #tpu.memory_space<vmem>>, %arg3: memref<4x8x32xbf16, #tpu.memory_space<vmem>>, %arg4: memref<4x16x32xbf16, #tpu.memory_space<vmem>>, %arg5: memref<4x16x32xbf16, #tpu.memory_space<vmem>>, %arg6: memref<4x32x32xbf16, #tpu.memory_space<vmem>>, %arg7: memref<8x32xf32, #tpu.memory_space<vmem>>, %arg8: memref<4x8x32xf32, #tpu.memory_space<vmem>>, %arg9: memref<16x8x8xbf16, #tpu.memory_space<vmem>>, %arg10: memref<16x8x1xf32, #tpu.memory_space<vmem>>, %arg11: memref<16x8x1xf32, #tpu.memory_space<vmem>>, %arg12: memref<16x8x8xf32, #tpu.memory_space<vmem>>) attributes {dimension_semantics = [#tpu.dimension_semantics<parallel>, #tpu.dimension_semantics<arbitrary>], iteration_bounds = array<i64: 1, 1>, scalar_prefetch = 0 : i64, scratch_operands = 4 : i64, tpu.core_type = #tpu.core_type<tc>, window_params = [{transform_indices = @transform_0, window_bounds = array<i64: 4, 8, 32>}, {transform_indices = @transform_1, window_bounds = array<i64: 4, 8, 32>}, {transform_indices = @transform_2, window_bounds = array<i64: 4, 16, 32>}, {transform_indices = @transform_3, window_bounds = array<i64: 4, 16, 32>}, {pipeline_mode = #tpu.pipeline_mode<synchronous>, transform_indices = @transform_4, window_bounds = array<i64: 4, 32, 32>}, {pipeline_mode = #tpu.pipeline_mode<synchronous>, transform_indices = @transform_5, window_bounds = array<i64: 8, 32>}, {transform_indices = @transform_6, window_bounds = array<i64: 4, 8, 32>}]} {
    %c0 = arith.constant 0 : index
    %c0_0 = arith.constant 0 : index
    %0 = vector.load %arg7[%c0, %c0_0] : memref<8x32xf32, #tpu.memory_space<vmem>>, vector<8x32xf32>
    %c0_i32 = arith.constant 0 : i32
    %1 = arith.cmpi eq, %arg1, %c0_i32 : i32
    %2 = arith.extui %1 : i1 to i32
    %c0_i32_1 = arith.constant 0 : i32
    %3 = arith.cmpi ne, %2, %c0_i32_1 : i32
    scf.if %3 {
      %c0_43 = arith.constant 0 : index
      %c0_44 = arith.constant 0 : index
      %c0_45 = arith.constant 0 : index
      %73 = vector.load %arg2[%c0_43, %c0_44, %c0_45] : memref<4x8x32xbf16, #tpu.memory_space<vmem>>, vector<4x8x32xbf16>
      %c0_46 = arith.constant 0 : index
      %c0_47 = arith.constant 0 : index
      %c0_48 = arith.constant 0 : index
      %74 = vector.load %arg3[%c0_46, %c0_47, %c0_48] : memref<4x8x32xbf16, #tpu.memory_space<vmem>>, vector<4x8x32xbf16>
      %75 = arith.addf %73, %74 : vector<4x8x32xbf16>
      %76 = vector.shape_cast %75 : vector<4x8x32xbf16> to vector<32x32xbf16>
      %c0_49 = arith.constant 0 : index
      %c0_50 = arith.constant 0 : index
      %c0_51 = arith.constant 0 : index
      %77 = vector.load %arg6[%c0_49, %c0_50, %c0_51] : memref<4x32x32xbf16, #tpu.memory_space<vmem>>, vector<1x32x32xbf16>
      %78 = vector.shape_cast %77 : vector<1x32x32xbf16> to vector<32x32xbf16>
      %cst_52 = arith.constant dense<0.000000e+00> : vector<32x32xf32>
      %79 = tpu.matmul %76, %78, %cst_52 {dimension_numbers = #tpu.dot_dimension_numbers<[1], [0], [0], [1], [0, 0, 1, 1], [], []>} : vector<32x32xbf16>, vector<32x32xbf16>, vector<32x32xf32> -> vector<32x32xf32>
      %80 = vector.extract_strided_slice %0 {offsets = [0, 0], sizes = [1, 32], strides = [1, 1]} : vector<8x32xf32> to vector<1x32xf32>
      %81 = vector.broadcast %80 : vector<1x32xf32> to vector<32x32xf32>
      %82 = arith.addf %79, %81 : vector<32x32xf32>
      %83 = arith.truncf %82 : vector<32x32xf32> to vector<32x32xbf16>
      %84 = vector.extract_strided_slice %83 {offsets = [0, 0], sizes = [32, 8], strides = [1, 1]} : vector<32x32xbf16> to vector<32x8xbf16>
      %85 = vector.extract_strided_slice %83 {offsets = [0, 8], sizes = [32, 8], strides = [1, 1]} : vector<32x32xbf16> to vector<32x8xbf16>
      %86 = vector.extract_strided_slice %83 {offsets = [0, 16], sizes = [32, 8], strides = [1, 1]} : vector<32x32xbf16> to vector<32x8xbf16>
      %87 = vector.extract_strided_slice %83 {offsets = [0, 24], sizes = [32, 8], strides = [1, 1]} : vector<32x32xbf16> to vector<32x8xbf16>
      %88 = vector.shape_cast %84 : vector<32x8xbf16> to vector<1x32x8xbf16>
      %89 = vector.shape_cast %85 : vector<32x8xbf16> to vector<1x32x8xbf16>
      %90 = vector.shape_cast %86 : vector<32x8xbf16> to vector<1x32x8xbf16>
      %91 = vector.shape_cast %87 : vector<32x8xbf16> to vector<1x32x8xbf16>
      %92 = tpu.concatenate %88, %89, %90, %91 in 0 : vector<1x32x8xbf16>, vector<1x32x8xbf16>, vector<1x32x8xbf16>, vector<1x32x8xbf16> -> vector<4x32x8xbf16>
      %93 = vector.shape_cast %92 : vector<4x32x8xbf16> to vector<16x8x8xbf16>
      %c0_53 = arith.constant 0 : index
      %c0_54 = arith.constant 0 : index
      %c0_55 = arith.constant 0 : index
      %94 = vector.load %arg9[%c0_53, %c0_54, %c0_55] : memref<16x8x8xbf16, #tpu.memory_space<vmem>>, vector<16x8x8xbf16>
      tpu.vector_store %arg9[%c0_53, %c0_54, %c0_55], %93 {strides = array<i32>} : memref<16x8x8xbf16, #tpu.memory_space<vmem>>, vector<16x8x8xbf16>,
      %cst_56 = arith.constant 0xFF800000 : f32
      %95 = vector.broadcast %cst_56 : f32 to vector<16x8x1xf32>
      %c0_57 = arith.constant 0 : index
      %c0_58 = arith.constant 0 : index
      %c0_59 = arith.constant 0 : index
      %96 = vector.load %arg10[%c0_57, %c0_58, %c0_59] : memref<16x8x1xf32, #tpu.memory_space<vmem>>, vector<16x8x1xf32>
      tpu.vector_store %arg10[%c0_57, %c0_58, %c0_59], %95 {strides = array<i32>} : memref<16x8x1xf32, #tpu.memory_space<vmem>>, vector<16x8x1xf32>,
      %cst_60 = arith.constant 0.000000e+00 : f32
      %97 = vector.broadcast %cst_60 : f32 to vector<16x8x1xf32>
      %c0_61 = arith.constant 0 : index
      %c0_62 = arith.constant 0 : index
      %c0_63 = arith.constant 0 : index
      %98 = vector.load %arg11[%c0_61, %c0_62, %c0_63] : memref<16x8x1xf32, #tpu.memory_space<vmem>>, vector<16x8x1xf32>
      tpu.vector_store %arg11[%c0_61, %c0_62, %c0_63], %97 {strides = array<i32>} : memref<16x8x1xf32, #tpu.memory_space<vmem>>, vector<16x8x1xf32>,
      %cst_64 = arith.constant 0.000000e+00 : f32
      %99 = vector.broadcast %cst_64 : f32 to vector<16x8x8xf32>
      %c0_65 = arith.constant 0 : index
      %c0_66 = arith.constant 0 : index
      %c0_67 = arith.constant 0 : index
      %100 = vector.load %arg12[%c0_65, %c0_66, %c0_67] : memref<16x8x8xf32, #tpu.memory_space<vmem>>, vector<16x8x8xf32>
      tpu.vector_store %arg12[%c0_65, %c0_66, %c0_67], %99 {strides = array<i32>} : memref<16x8x8xf32, #tpu.memory_space<vmem>>, vector<16x8x8xf32>,
    } else {
    }
    %c0_2 = arith.constant 0 : index
    %c0_3 = arith.constant 0 : index
    %c0_4 = arith.constant 0 : index
    %4 = vector.load %arg4[%c0_2, %c0_3, %c0_4] : memref<4x16x32xbf16, #tpu.memory_space<vmem>>, vector<4x16x32xbf16>
    %c0_5 = arith.constant 0 : index
    %c0_6 = arith.constant 0 : index
    %c0_7 = arith.constant 0 : index
    %5 = vector.load %arg5[%c0_5, %c0_6, %c0_7] : memref<4x16x32xbf16, #tpu.memory_space<vmem>>, vector<4x16x32xbf16>
    %6 = arith.addf %4, %5 : vector<4x16x32xbf16>
    %7 = vector.shape_cast %6 : vector<4x16x32xbf16> to vector<64x32xbf16>
    %c0_8 = arith.constant 0 : index
    %c0_9 = arith.constant 0 : index
    %c0_10 = arith.constant 0 : index
    %8 = vector.load %arg4[%c0_8, %c0_9, %c0_10] : memref<4x16x32xbf16, #tpu.memory_space<vmem>>, vector<4x16x32xbf16>
    %9 = vector.shape_cast %8 : vector<4x16x32xbf16> to vector<64x32xbf16>
    %c1 = arith.constant 1 : index
    %c0_11 = arith.constant 0 : index
    %c0_12 = arith.constant 0 : index
    %10 = vector.load %arg6[%c1, %c0_11, %c0_12] : memref<4x32x32xbf16, #tpu.memory_space<vmem>>, vector<1x32x32xbf16>
    %11 = vector.shape_cast %10 : vector<1x32x32xbf16> to vector<32x32xbf16>
    %cst = arith.constant dense<0.000000e+00> : vector<64x32xf32>
    %12 = tpu.matmul %7, %11, %cst {dimension_numbers = #tpu.dot_dimension_numbers<[1], [0], [0], [1], [0, 0, 1, 1], [], []>} : vector<64x32xbf16>, vector<32x32xbf16>, vector<64x32xf32> -> vector<64x32xf32>
    %13 = vector.extract_strided_slice %0 {offsets = [1, 0], sizes = [1, 32], strides = [1, 1]} : vector<8x32xf32> to vector<1x32xf32>
    %14 = vector.broadcast %13 : vector<1x32xf32> to vector<64x32xf32>
    %15 = arith.addf %12, %14 : vector<64x32xf32>
    %c2 = arith.constant 2 : index
    %c0_13 = arith.constant 0 : index
    %c0_14 = arith.constant 0 : index
    %16 = vector.load %arg6[%c2, %c0_13, %c0_14] : memref<4x32x32xbf16, #tpu.memory_space<vmem>>, vector<1x32x32xbf16>
    %17 = vector.shape_cast %16 : vector<1x32x32xbf16> to vector<32x32xbf16>
    %cst_15 = arith.constant dense<0.000000e+00> : vector<64x32xf32>
    %18 = tpu.matmul %9, %17, %cst_15 {dimension_numbers = #tpu.dot_dimension_numbers<[1], [0], [0], [1], [0, 0, 1, 1], [], []>} : vector<64x32xbf16>, vector<32x32xbf16>, vector<64x32xf32> -> vector<64x32xf32>
    %19 = vector.extract_strided_slice %0 {offsets = [2, 0], sizes = [1, 32], strides = [1, 1]} : vector<8x32xf32> to vector<1x32xf32>
    %20 = vector.broadcast %19 : vector<1x32xf32> to vector<64x32xf32>
    %21 = arith.addf %18, %20 : vector<64x32xf32>
    %22 = arith.truncf %15 : vector<64x32xf32> to vector<64x32xbf16>
    %23 = vector.extract_strided_slice %22 {offsets = [0, 0], sizes = [64, 8], strides = [1, 1]} : vector<64x32xbf16> to vector<64x8xbf16>
    %24 = vector.extract_strided_slice %22 {offsets = [0, 8], sizes = [64, 8], strides = [1, 1]} : vector<64x32xbf16> to vector<64x8xbf16>
    %25 = vector.extract_strided_slice %22 {offsets = [0, 16], sizes = [64, 8], strides = [1, 1]} : vector<64x32xbf16> to vector<64x8xbf16>
    %26 = vector.extract_strided_slice %22 {offsets = [0, 24], sizes = [64, 8], strides = [1, 1]} : vector<64x32xbf16> to vector<64x8xbf16>
    %27 = vector.shape_cast %23 : vector<64x8xbf16> to vector<1x64x8xbf16>
    %28 = vector.shape_cast %24 : vector<64x8xbf16> to vector<1x64x8xbf16>
    %29 = vector.shape_cast %25 : vector<64x8xbf16> to vector<1x64x8xbf16>
    %30 = vector.shape_cast %26 : vector<64x8xbf16> to vector<1x64x8xbf16>
    %31 = tpu.concatenate %27, %28, %29, %30 in 0 : vector<1x64x8xbf16>, vector<1x64x8xbf16>, vector<1x64x8xbf16>, vector<1x64x8xbf16> -> vector<4x64x8xbf16>
    %32 = vector.shape_cast %31 : vector<4x64x8xbf16> to vector<16x16x8xbf16>
    %33 = arith.truncf %21 : vector<64x32xf32> to vector<64x32xbf16>
    %34 = vector.extract_strided_slice %33 {offsets = [0, 0], sizes = [64, 8], strides = [1, 1]} : vector<64x32xbf16> to vector<64x8xbf16>
    %35 = vector.extract_strided_slice %33 {offsets = [0, 8], sizes = [64, 8], strides = [1, 1]} : vector<64x32xbf16> to vector<64x8xbf16>
    %36 = vector.extract_strided_slice %33 {offsets = [0, 16], sizes = [64, 8], strides = [1, 1]} : vector<64x32xbf16> to vector<64x8xbf16>
    %37 = vector.extract_strided_slice %33 {offsets = [0, 24], sizes = [64, 8], strides = [1, 1]} : vector<64x32xbf16> to vector<64x8xbf16>
    %38 = vector.shape_cast %34 : vector<64x8xbf16> to vector<1x64x8xbf16>
    %39 = vector.shape_cast %35 : vector<64x8xbf16> to vector<1x64x8xbf16>
    %40 = vector.shape_cast %36 : vector<64x8xbf16> to vector<1x64x8xbf16>
    %41 = vector.shape_cast %37 : vector<64x8xbf16> to vector<1x64x8xbf16>
    %42 = tpu.concatenate %38, %39, %40, %41 in 0 : vector<1x64x8xbf16>, vector<1x64x8xbf16>, vector<1x64x8xbf16>, vector<1x64x8xbf16> -> vector<4x64x8xbf16>
    %43 = vector.shape_cast %42 : vector<4x64x8xbf16> to vector<16x16x8xbf16>
    %c0_16 = arith.constant 0 : index
    %c0_17 = arith.constant 0 : index
    %c0_18 = arith.constant 0 : index
    %44 = vector.load %arg9[%c0_16, %c0_17, %c0_18] : memref<16x8x8xbf16, #tpu.memory_space<vmem>>, vector<16x8x8xbf16>
    %cst_19 = arith.constant dense<0.000000e+00> : vector<16x8x16xf32>
    %45 = tpu.matmul %44, %32, %cst_19 {dimension_numbers = #tpu.dot_dimension_numbers<[2], [2], [1], [1], [0, 0, 0, 1, 1, 1], [0], [0]>} : vector<16x8x8xbf16>, vector<16x16x8xbf16>, vector<16x8x16xf32> -> vector<16x8x16xf32>
    %c0_20 = arith.constant 0 : index
    %c0_21 = arith.constant 0 : index
    %c0_22 = arith.constant 0 : index
    %46 = vector.load %arg10[%c0_20, %c0_21, %c0_22] : memref<16x8x1xf32, #tpu.memory_space<vmem>>, vector<16x8x1xf32>
    %cst_23 = arith.constant dense<0xFF800000> : vector<16x8xf32>
    %47 = vector.multi_reduction <maximumf>, %45, %cst_23 [2] : vector<16x8x16xf32> to vector<16x8xf32>
    %48 = vector.shape_cast %47 : vector<16x8xf32> to vector<16x8x1xf32>
    %49 = arith.maximumf %46, %48 : vector<16x8x1xf32>
    %50 = arith.subf %46, %49 : vector<16x8x1xf32>
    %51 = math.exp %50 : vector<16x8x1xf32>
    %52 = vector.broadcast %49 : vector<16x8x1xf32> to vector<16x8x16xf32>
    %53 = arith.subf %45, %52 : vector<16x8x16xf32>
    %54 = arith.truncf %53 : vector<16x8x16xf32> to vector<16x8x16xbf16>
    %55 = math.exp %54 : vector<16x8x16xbf16>
    %c0_24 = arith.constant 0 : index
    %c0_25 = arith.constant 0 : index
    %c0_26 = arith.constant 0 : index
    %56 = vector.load %arg11[%c0_24, %c0_25, %c0_26] : memref<16x8x1xf32, #tpu.memory_space<vmem>>, vector<16x8x1xf32>
    %57 = arith.mulf %51, %56 : vector<16x8x1xf32>
    %58 = arith.extf %55 : vector<16x8x16xbf16> to vector<16x8x16xf32>
    %cst_27 = arith.constant dense<0.000000e+00> : vector<16x8xf32>
    %59 = vector.multi_reduction <add>, %58, %cst_27 [2] : vector<16x8x16xf32> to vector<16x8xf32>
    %60 = vector.shape_cast %59 : vector<16x8xf32> to vector<16x8x1xf32>
    %61 = arith.addf %57, %60 : vector<16x8x1xf32>
    %c0_28 = arith.constant 0 : index
    %c0_29 = arith.constant 0 : index
    %c0_30 = arith.constant 0 : index
    %62 = vector.load %arg11[%c0_28, %c0_29, %c0_30] : memref<16x8x1xf32, #tpu.memory_space<vmem>>, vector<16x8x1xf32>
    tpu.vector_store %arg11[%c0_28, %c0_29, %c0_30], %61 {strides = array<i32>} : memref<16x8x1xf32, #tpu.memory_space<vmem>>, vector<16x8x1xf32>,
    %c0_31 = arith.constant 0 : index
    %c0_32 = arith.constant 0 : index
    %c0_33 = arith.constant 0 : index
    %63 = vector.load %arg12[%c0_31, %c0_32, %c0_33] : memref<16x8x8xf32, #tpu.memory_space<vmem>>, vector<16x8x8xf32>
    %64 = vector.broadcast %51 : vector<16x8x1xf32> to vector<16x8x8xf32>
    %65 = arith.mulf %64, %63 : vector<16x8x8xf32>
    %cst_34 = arith.constant dense<0.000000e+00> : vector<16x8x8xf32>
    %66 = tpu.matmul %55, %43, %cst_34 {dimension_numbers = #tpu.dot_dimension_numbers<[2], [1], [1], [2], [0, 0, 0, 1, 1, 2], [0], [0]>} : vector<16x8x16xbf16>, vector<16x16x8xbf16>, vector<16x8x8xf32> -> vector<16x8x8xf32>
    %67 = arith.addf %65, %66 : vector<16x8x8xf32>
    %c0_35 = arith.constant 0 : index
    %c0_36 = arith.constant 0 : index
    %c0_37 = arith.constant 0 : index
    %68 = vector.load %arg12[%c0_35, %c0_36, %c0_37] : memref<16x8x8xf32, #tpu.memory_space<vmem>>, vector<16x8x8xf32>
    tpu.vector_store %arg12[%c0_35, %c0_36, %c0_37], %67 {strides = array<i32>} : memref<16x8x8xf32, #tpu.memory_space<vmem>>, vector<16x8x8xf32>,
    %c0_38 = arith.constant 0 : index
    %c0_39 = arith.constant 0 : index
    %c0_40 = arith.constant 0 : index
    %69 = vector.load %arg10[%c0_38, %c0_39, %c0_40] : memref<16x8x1xf32, #tpu.memory_space<vmem>>, vector<16x8x1xf32>
    tpu.vector_store %arg10[%c0_38, %c0_39, %c0_40], %49 {strides = array<i32>} : memref<16x8x1xf32, #tpu.memory_space<vmem>>, vector<16x8x1xf32>,
    %c0_i32_41 = arith.constant 0 : i32
    %70 = arith.cmpi eq, %arg1, %c0_i32_41 : i32
    %71 = arith.extui %70 : i1 to i32
    %c0_i32_42 = arith.constant 0 : i32
    %72 = arith.cmpi ne, %71, %c0_i32_42 : i32
    scf.if %72 {
      %c0_43 = arith.constant 0 : index
      %c0_44 = arith.constant 0 : index
      %c0_45 = arith.constant 0 : index
      %73 = vector.load %arg11[%c0_43, %c0_44, %c0_45] : memref<16x8x1xf32, #tpu.memory_space<vmem>>, vector<16x8x1xf32>
      %74 = tpu.reciprocal %73 {approx = true} : vector<16x8x1xf32> -> vector<16x8x1xf32>
      %c0_46 = arith.constant 0 : index
      %c0_47 = arith.constant 0 : index
      %c0_48 = arith.constant 0 : index
      %75 = vector.load %arg12[%c0_46, %c0_47, %c0_48] : memref<16x8x8xf32, #tpu.memory_space<vmem>>, vector<16x8x8xf32>
      %76 = vector.broadcast %74 : vector<16x8x1xf32> to vector<16x8x8xf32>
      %77 = arith.mulf %75, %76 : vector<16x8x8xf32>
      %78 = arith.truncf %77 : vector<16x8x8xf32> to vector<16x8x8xbf16>
      %79 = vector.shape_cast %78 : vector<16x8x8xbf16> to vector<4x32x8xbf16>
      %80 = vector.extract_strided_slice %79 {offsets = [0, 0, 0], sizes = [1, 32, 8], strides = [1, 1, 1]} : vector<4x32x8xbf16> to vector<1x32x8xbf16>
      %81 = vector.shape_cast %80 : vector<1x32x8xbf16> to vector<32x8xbf16>
      %82 = vector.extract_strided_slice %79 {offsets = [1, 0, 0], sizes = [1, 32, 8], strides = [1, 1, 1]} : vector<4x32x8xbf16> to vector<1x32x8xbf16>
      %83 = vector.shape_cast %82 : vector<1x32x8xbf16> to vector<32x8xbf16>
      %84 = vector.extract_strided_slice %79 {offsets = [2, 0, 0], sizes = [1, 32, 8], strides = [1, 1, 1]} : vector<4x32x8xbf16> to vector<1x32x8xbf16>
      %85 = vector.shape_cast %84 : vector<1x32x8xbf16> to vector<32x8xbf16>
      %86 = vector.extract_strided_slice %79 {offsets = [3, 0, 0], sizes = [1, 32, 8], strides = [1, 1, 1]} : vector<4x32x8xbf16> to vector<1x32x8xbf16>
      %87 = vector.shape_cast %86 : vector<1x32x8xbf16> to vector<32x8xbf16>
      %88 = tpu.concatenate %81, %83, %85, %87 in 1 : vector<32x8xbf16>, vector<32x8xbf16>, vector<32x8xbf16>, vector<32x8xbf16> -> vector<32x32xbf16>
      %c3 = arith.constant 3 : index
      %c0_49 = arith.constant 0 : index
      %c0_50 = arith.constant 0 : index
      %89 = vector.load %arg6[%c3, %c0_49, %c0_50] : memref<4x32x32xbf16, #tpu.memory_space<vmem>>, vector<1x32x32xbf16>
      %90 = vector.shape_cast %89 : vector<1x32x32xbf16> to vector<32x32xbf16>
      %cst_51 = arith.constant dense<0.000000e+00> : vector<32x32xf32>
      %91 = tpu.matmul %88, %90, %cst_51 {dimension_numbers = #tpu.dot_dimension_numbers<[1], [0], [0], [1], [0, 0, 1, 1], [], []>} : vector<32x32xbf16>, vector<32x32xbf16>, vector<32x32xf32> -> vector<32x32xf32>
      %92 = vector.extract_strided_slice %0 {offsets = [3, 0], sizes = [1, 32], strides = [1, 1]} : vector<8x32xf32> to vector<1x32xf32>
      %93 = vector.broadcast %92 : vector<1x32xf32> to vector<32x32xf32>
      %94 = arith.addf %91, %93 : vector<32x32xf32>
      %c0_52 = arith.constant 0 : index
      %c0_53 = arith.constant 0 : index
      %c0_54 = arith.constant 0 : index
      %95 = vector.load %arg2[%c0_52, %c0_53, %c0_54] : memref<4x8x32xbf16, #tpu.memory_space<vmem>>, vector<4x8x32xbf16>
      %96 = arith.extf %95 : vector<4x8x32xbf16> to vector<4x8x32xf32>
      %97 = vector.shape_cast %96 : vector<4x8x32xf32> to vector<32x32xf32>
      %98 = arith.addf %97, %94 : vector<32x32xf32>
      %cst_55 = arith.constant dense<0.000000e+00> : vector<32xf32>
      %99 = vector.multi_reduction <add>, %98, %cst_55 [1] : vector<32x32xf32> to vector<32xf32>
      %100 = vector.shape_cast %99 : vector<32xf32> to vector<32x1xf32>
      %cst_56 = arith.constant 3.200000e+01 : f32
      %101 = vector.broadcast %cst_56 : f32 to vector<32x1xf32>
      %102 = arith.divf %100, %101 : vector<32x1xf32>
      %103 = vector.broadcast %102 : vector<32x1xf32> to vector<32x32xf32>
      %104 = arith.subf %98, %103 : vector<32x32xf32>
      %105 = arith.mulf %104, %104 : vector<32x32xf32>
      %cst_57 = arith.constant dense<0.000000e+00> : vector<32xf32>
      %106 = vector.multi_reduction <add>, %105, %cst_57 [1] : vector<32x32xf32> to vector<32xf32>
      %107 = vector.shape_cast %106 : vector<32xf32> to vector<32x1xf32>
      %cst_58 = arith.constant 3.200000e+01 : f32
      %108 = vector.broadcast %cst_58 : f32 to vector<32x1xf32>
      %109 = arith.divf %107, %108 : vector<32x1xf32>
      %cst_59 = arith.constant 9.99999974E-6 : f32
      %110 = vector.broadcast %cst_59 : f32 to vector<32x1xf32>
      %111 = arith.addf %109, %110 : vector<32x1xf32>
      %112 = math.rsqrt %111 : vector<32x1xf32>
      %113 = vector.broadcast %112 : vector<32x1xf32> to vector<32x32xf32>
      %114 = arith.mulf %104, %113 : vector<32x32xf32>
      %115 = vector.extract_strided_slice %0 {offsets = [4, 0], sizes = [1, 32], strides = [1, 1]} : vector<8x32xf32> to vector<1x32xf32>
      %116 = vector.broadcast %115 : vector<1x32xf32> to vector<32x32xf32>
      %117 = arith.mulf %114, %116 : vector<32x32xf32>
      %118 = vector.extract_strided_slice %0 {offsets = [5, 0], sizes = [1, 32], strides = [1, 1]} : vector<8x32xf32> to vector<1x32xf32>
      %119 = vector.broadcast %118 : vector<1x32xf32> to vector<32x32xf32>
      %120 = arith.addf %117, %119 : vector<32x32xf32>
      %121 = vector.shape_cast %120 : vector<32x32xf32> to vector<4x8x32xf32>
      %c0_60 = arith.constant 0 : index
      %c0_61 = arith.constant 0 : index
      %c0_62 = arith.constant 0 : index
      %122 = vector.load %arg8[%c0_60, %c0_61, %c0_62] : memref<4x8x32xf32, #tpu.memory_space<vmem>>, vector<4x8x32xf32>
      tpu.vector_store %arg8[%c0_60, %c0_61, %c0_62], %121 {strides = array<i32>} : memref<4x8x32xf32, #tpu.memory_space<vmem>>, vector<4x8x32xf32>,
    } else {
    }
    return
  }
  func.func @transform_0(%arg0: i32, %arg1: i32) -> (i32, i32, i32) {
    %c0_i32 = arith.constant 0 : i32
    %c0_i32_0 = arith.constant 0 : i32
    %c0_i32_1 = arith.constant 0 : i32
    return %arg0, %c0_i32, %c0_i32_0 : i32, i32, i32
  }
  func.func @transform_1(%arg0: i32, %arg1: i32) -> (i32, i32, i32) {
    %c0_i32 = arith.constant 0 : i32
    %c0_i32_0 = arith.constant 0 : i32
    %c0_i32_1 = arith.constant 0 : i32
    return %arg0, %c0_i32, %c0_i32_0 : i32, i32, i32
  }
  func.func @transform_2(%arg0: i32, %arg1: i32) -> (i32, i32, i32) {
    %c0_i32 = arith.constant 0 : i32
    %c0_i32_0 = arith.constant 0 : i32
    return %arg0, %arg1, %c0_i32 : i32, i32, i32
  }
  func.func @transform_3(%arg0: i32, %arg1: i32) -> (i32, i32, i32) {
    %c0_i32 = arith.constant 0 : i32
    %c0_i32_0 = arith.constant 0 : i32
    return %arg0, %arg1, %c0_i32 : i32, i32, i32
  }
  func.func @transform_4(%arg0: i32, %arg1: i32) -> (i32, i32, i32) {
    %c0_i32 = arith.constant 0 : i32
    %c0_i32_0 = arith.constant 0 : i32
    %c0_i32_1 = arith.constant 0 : i32
    %c0_i32_2 = arith.constant 0 : i32
    return %c0_i32, %c0_i32_0, %c0_i32_1 : i32, i32, i32
  }
  func.func @transform_5(%arg0: i32, %arg1: i32) -> (i32, i32) {
    %c0_i32 = arith.constant 0 : i32
    %c0_i32_0 = arith.constant 0 : i32
    %c0_i32_1 = arith.constant 0 : i32
    return %c0_i32, %c0_i32_0 : i32, i32
  }
  func.func @transform_6(%arg0: i32, %arg1: i32) -> (i32, i32, i32) {
    %c0_i32 = arith.constant 0 : i32
    %c0_i32_0 = arith.constant 0 : i32
    %c0_i32_1 = arith.constant 0 : i32
    return %arg0, %c0_i32, %c0_i32_0 : i32, i32, i32
  }
}

</mosaic_0001>

<bundles_post_ra>
// kernel: tpu_custom_call.1
= control target key start
LH: loop header
LB: loop body
LE: loop exit
PB: predicated region body
PF: predicated region fallthrough
CT: control target
= control target key end

     0   :  { %11 = vsyncpa [#allocation7], 0  ;;  %s4662_s0 = inlined_call_operand.hbm [shape: bf16[4,8,32], index: 0, kind: input, shape index: {}]   ;;  %s4663_s1 = inlined_call_operand.hbm [shape: bf16[4,8,32], index: 1, kind: input, shape index: {}]   ;;  %s4664_s2 = inlined_call_operand.hbm [shape: bf16[4,16,32], index: 2, kind: input, shape index: {}]   ;;  %s4665_s3 = inlined_call_operand.hbm [shape: bf16[4,16,32], index: 3, kind: input, shape index: {}]   ;;  %s4666_s4 = inlined_call_operand.hbm [shape: bf16[4,32,32], index: 4, kind: input, shape index: {}]   ;;  %s4667_s5 = inlined_call_operand.vmem [shape: f32[8,32], index: 5, kind: input, shape index: {}]   ;;  %s4668_s6 = inlined_call_operand.hbm [shape: f32[4,8,32], index: 6, kind: output, shape index: {}]  }
   0x1   :  { %12 = vsyncpa [#allocation10], 0 }
   0x2   :  { %13 = vsyncpa [#allocation13], 0 }
   0x3   :  { %14 = vsyncpa [#allocation8], 0  ;;  %s3778_s21 = smov [#allocation9]   ;;  %s3779_s23 = smov [#allocation12]  }
   0x4   :  { %s32_s22 = sshll.u32 %s3778_s21, 4  ;;  %s56_s24 = sshll.u32 %s3779_s23, 4  ;;  %s33_s22 = int_to_ptr.vmem [resolvable:$true] %s32_s22  ;;  %s57_s24 = int_to_ptr.vmem [resolvable:$true] %s56_s24 }
   0x5   :  { %s3658_s25 = scalar_lea.vmem %s33_s22, 256  ;;  %p3663_p1 = scmp.lt.s32.totalorder %s33_s22, %s33_s22 }
   0x6   :  { %p3659_p0 = scmp.ne.s32.totalorder %s33_s22, %s3658_s25  ;;  %p3664_p2 = scmp.lt.s32.totalorder %s3658_s25, %s3658_s25 }
   0x8   :  { %p3665_p3 = por %p3664_p2, %p3663_p1 }
   0xa   :  { %p3666_p4 = pnand %p3665_p3, %p3659_p0 }
   0xc   :  { %3669 = shalt.err (!%p3666_p4)
}
   0xd   :  { %s3780_s26 = smov 64   ;;  %s3781_s27 = smov 4  }
   0xe   :  { %38 = dma.hbm_to_vmem [thread:$0]  %s4663_s1, 256, %s33_s22, [#allocation10], %s3780_s26, %s3780_s26, %s3781_s27  }
   0xf   :  { %s3678_s30 = scalar_lea.vmem %s57_s24, 512  ;;  %p3683_p6 = scmp.lt.s32.totalorder %s57_s24, %s57_s24 }
  0x10   :  { %p3679_p5 = scmp.ne.s32.totalorder %s57_s24, %s3678_s30  ;;  %p3684_p7 = scmp.lt.s32.totalorder %s3678_s30, %s3678_s30 }
  0x12   :  { %p3685_p8 = por %p3684_p7, %p3683_p6 }
  0x14   :  { %p3686_p9 = pnand %p3685_p8, %p3679_p5 }
  0x16   :  { %3689 = shalt.err (!%p3686_p9)
}
  0x17   :  { %62 = dma.hbm_to_vmem [thread:$0]  %s4665_s3, 512, %s57_s24, [#allocation13], %s3780_s26, %s3780_s26, %s3781_s27  }
  0x18   :  { %s3782_s9 = smov [#allocation6]   ;;  %s3783_s11 = smov [#allocation11]  }
  0x19   :  { %s20_s10 = sshll.u32 %s3782_s9, 4  ;;  %s44_s12 = sshll.u32 %s3783_s11, 4  ;;  %s21_s10 = int_to_ptr.vmem [resolvable:$true] %s20_s10  ;;  %s45_s12 = int_to_ptr.vmem [resolvable:$true] %s44_s12 }
  0x1a   :  { %s3698_s1 = scalar_lea.vmem %s21_s10, 256  ;;  %p3703_p11 = scmp.lt.s32.totalorder %s21_s10, %s21_s10 }
  0x1b   :  { %p3699_p10 = scmp.ne.s32.totalorder %s21_s10, %s3698_s1  ;;  %p3704_p12 = scmp.lt.s32.totalorder %s3698_s1, %s3698_s1 }
  0x1d   :  { %p3705_p13 = por %p3704_p12, %p3703_p11 }
  0x1f   :  { %p3706_p0 = pnand %p3705_p13, %p3699_p10 }
  0x21   :  { %3709 = shalt.err (!%p3706_p0)
}
  0x22   :  { %26 = dma.hbm_to_vmem [thread:$0]  %s4662_s0, 256, %s21_s10, [#allocation7], %s3780_s26, %s3780_s26, %s3781_s27  }
  0x23   :  { %s3718_s3 = scalar_lea.vmem %s45_s12, 512  ;;  %p3723_p2 = scmp.lt.s32.totalorder %s45_s12, %s45_s12 }
  0x24   :  { %p3719_p1 = scmp.ne.s32.totalorder %s45_s12, %s3718_s3  ;;  %p3724_p3 = scmp.lt.s32.totalorder %s3718_s3, %s3718_s3 }
  0x26   :  { %p3725_p4 = por %p3724_p3, %p3723_p2 }
  0x28   :  { %p3726_p5 = pnand %p3725_p4, %p3719_p1 }
  0x2a   :  { %3729 = shalt.err (!%p3726_p5)
}
  0x2b   :  { %50 = dma.hbm_to_vmem [thread:$0]  %s4664_s2, 512, %s45_s12, [#allocation10], %s3780_s26, %s3780_s26, %s3781_s27  }
  0x2c   :  { %s3784_s17 = smov [#allocation14]  }
  0x2d   :  { %s68_s18 = sshll.u32 %s3784_s17, 4  ;;  %s69_s18 = int_to_ptr.vmem [resolvable:$true] %s68_s18 }
  0x2e   :  { %s3738_s19 = scalar_lea.vmem %s69_s18, 1024  ;;  %p3743_p7 = scmp.lt.s32.totalorder %s69_s18, %s69_s18 }
  0x2f   :  { %p3739_p6 = scmp.ne.s32.totalorder %s69_s18, %s3738_s19  ;;  %p3744_p8 = scmp.lt.s32.totalorder %s3738_s19, %s3738_s19 }
  0x31   :  { %p3745_p9 = por %p3744_p8, %p3743_p7 }
  0x33   :  { %p3746_p10 = pnand %p3745_p9, %p3739_p6 }
  0x35   :  { %3749 = shalt.err (!%p3746_p10)
}
  0x36   :  { %74 = dma.hbm_to_vmem [thread:$0]  %s4666_s4, 1024, %s69_s18, [#allocation13], %s3780_s26, %s3780_s26, %s3781_s27  }
  0x37   :  { %3770 = dma.done.wait [#allocation7], 256  }
  0x38   :  { %3771 = vsyncadd [#allocation7], 4294967040 }
  0x39   :  { %3772 = dma.done.wait [#allocation10], 768  }
  0x3a   :  { %3773 = vsyncadd [#allocation10], 4294966528 }
  0x3b   :  { %3774 = dma.done.wait [#allocation13], 1536  }
  0x3c   :  { %3775 = vsyncadd [#allocation13], 4294965760  ;;  %v3535_v0 = vld [vmem:[#allocation14 + $0x8] sm:$0xff]   ;;  %v3536_v1 = vld [vmem:[#allocation14 + $0x18] sm:$0xff]   ;;  %vm140_vm0 = vcmask 261120   ;;  %vm310_vm1 = vcmask 64512   ;;  %v114_v53 = vlaneseq }
  0x3d   :  { %3282 = vmatprep.subr.bf16.mxu0 %v3535_v0  ;;  %v3537_v2 = vld [vmem:[#allocation14] sm:$0xff]   ;;  %3290 = vmatprep.subr.bf16.mxu1 %v3536_v1  ;;  %v3538_v3 = vld [vmem:[#allocation14 + $0x10] sm:$0xff]   ;;  %v100_v14 = vld [vmem:[#allocation6 + $0x8] sm:$0xf]  ;;  %v4669_v51 = vmov 0.0   ;;  %vm3786_vm2 = vmmov 0  }
  0x3e   :  { %3283 = vmatpush3.bf16.msra.mxu0 %v3535_v0  ;;  %3291 = vmatpush3.bf16.msra.mxu1 %v3536_v1  ;;  %v98_v4 = vld [vmem:[#allocation6] sm:$0xf]  ;;  %v99_v5 = vld [vmem:[#allocation6 + $0x4] sm:$0xf]  ;;  %v102_v6 = vld [vmem:[#allocation9] sm:$0xf] }
  0x3f   :  { %3284 = vmatprep.subr.bf16.mxu0 %v3537_v2  ;;  %3292 = vmatprep.subr.bf16.mxu1 %v3538_v3  ;;  %v103_v7 = vld [vmem:[#allocation9 + $0x4] sm:$0xf]  ;;  %v106_v8 = vadd.bf16 %v102_v6, %v98_v4  ;;  %v327_v9 = vld [vmem:[#allocation11] sm:$0xf]  ;;  %v328_v10 = vld [vmem:[#allocation11 + $0x4] sm:$0xf] }
  0x40   :  { %v107_v11 = vadd.bf16 %v103_v7, %v99_v5  ;;  %v335_v12 = vld [vmem:[#allocation12] sm:$0xf]  ;;  %v336_v13 = vld [vmem:[#allocation12 + $0x4] sm:$0xf]  ;;  %v101_v17 = vld [vmem:[#allocation6 + $0xc] sm:$0xf]  ;;  %v3123_v27 = vcombine.low %v327_v9, %v328_v10 }
  0x41   :  { %v343_v15 = vadd.bf16 %v335_v12, %v327_v9  ;;  %v344_v16 = vadd.bf16 %v336_v13, %v328_v10  ;;  %v104_v18 = vld [vmem:[#allocation9 + $0x8] sm:$0xf]  ;;  %v105_v19 = vld [vmem:[#allocation9 + $0xc] sm:$0xf]  ;;  %v329_v23 = vld [vmem:[#allocation11 + $0x8] sm:$0xf] }
  0x42   :  { %3285 = vmatpush3.bf16.msra.mxu0 %v3537_v2  ;;  %3293 = vmatpush3.bf16.msra.mxu1 %v3538_v3  ;;  %v3091_v20 = vcombine.low %v106_v8, %v107_v11  ;;  %v108_v21 = vadd.bf16 %v104_v18, %v100_v14  ;;  %v109_v22 = vadd.bf16 %v105_v19, %v101_v17  ;;  %v330_v24 = vld [vmem:[#allocation11 + $0xc] sm:$0xf]  ;;  %v337_v25 = vld [vmem:[#allocation12 + $0x8] sm:$0xf]  ;;  %v331_v30 = vld [vmem:[#allocation11 + $0x10] sm:$0xf] }
  0x43   :  { %v3113_v26 = vcombine.low %v343_v15, %v344_v16  ;;  %v338_v28 = vld [vmem:[#allocation12 + $0xc] sm:$0xf]  ;;  %v345_v29 = vadd.bf16 %v337_v25, %v329_v23  ;;  %v332_v31 = vld [vmem:[#allocation11 + $0x14] sm:$0xf]  ;;  %v339_v34 = vld [vmem:[#allocation12 + $0x10] sm:$0xf]  ;;  %v3124_v48 = vcombine.low %v329_v23, %v330_v24  ;;  %3314 = vmatprep.subr.bf16.mxu1 %v4669_v51 }
  0x44   :  { %3286 = vmatprep.mubr.msk.bf16.mxu0 %vm140_vm0, %v3091_v20  ;;  %v3092_v32 = vcombine.low %v108_v21, %v109_v22  ;;  %v346_v33 = vadd.bf16 %v338_v28, %v330_v24  ;;  %v340_v35 = vld [vmem:[#allocation12 + $0x14] sm:$0xf]  ;;  %v333_v36 = vld [vmem:[#allocation11 + $0x18] sm:$0xf]  ;;  %v347_v37 = vadd.bf16 %v339_v34, %v331_v30  ;;  %v334_v39 = vld [vmem:[#allocation11 + $0x1c] sm:$0xf]  ;;  %v3125_v50 = vcombine.low %v331_v30, %v332_v31 }
  0x45   :  { %3294 = vmatprep.mubr.msk.bf16.mxu1 %vm140_vm0, %v3113_v26  ;;  %v348_v38 = vadd.bf16 %v340_v35, %v332_v31  ;;  %v341_v40 = vld [vmem:[#allocation12 + $0x18] sm:$0xf]  ;;  %v342_v41 = vld [vmem:[#allocation12 + $0x1c] sm:$0xf]  ;;  %v3541_v43 = vld [vmem:[#allocation14 + $0x28] sm:$0xff]   ;;  %311 = vst.msk [vmem:[#allocation5] sm:$0xff] %vm310_vm1, %v4669_v51  ;;  %v3126_v52 = vcombine.low %v333_v36, %v334_v39 }
  0x46   :  { %3287 = vmatmul.mubr.msk.bf16.vlgmr.msra.gmra.mxu0 %vm140_vm0, %v3092_v32  ;;  %v3114_v42 = vcombine.low %v345_v29, %v346_v33  ;;  %v3542_v45 = vld [vmem:[#allocation14 + $0x20] sm:$0xff]   ;;  %v349_v46 = vadd.bf16 %v341_v40, %v333_v36  ;;  %v350_v47 = vadd.bf16 %v342_v41, %v334_v39  ;;  %3302 = vmatprep.subr.bf16.mxu0 %v3541_v43  ;;  %v3910_v54 = vshrl.u32 %v114_v53, 7  ;;  %s3787_s21 = smov 120   ;;  %s3788_s22 = smov 112  }
  0x47   :  { %v3115_v44 = vcombine.low %v347_v37, %v348_v38  ;;  %3306 = vmatprep.mubr.msk.bf16.mxu0 %vm140_vm0, %v3123_v27  ;;  %3303 = vmatpush3.bf16.msra.mxu0 %v3541_v43  ;;  %312 = vst.msk [vmem:[#allocation5 + $0x8] sm:$0xff] %vm310_vm1, %v4669_v51  ;;  %313 = vst.msk [vmem:[#allocation5 + $0x10] sm:$0xff] %vm310_vm1, %v4669_v51  ;;  %v3916_v56 = vld [vmem:[%s4667_s5] sm:$0xff]  ;;  %vm260_vm3 = vcmask 60416   ;;  %s3789_s23 = smov 104   ;;  %vm1433_vm4 = vcmask 130048  }
  0x48   :  { %3295 = vmatmul.mubr.msk.bf16.vlgmr.msra.gmra.mxu1 %vm140_vm0, %v3114_v42  ;;  %3304 = vmatprep.subr.bf16.mxu0 %v3542_v45  ;;  %v3116_v49 = vcombine.low %v349_v46, %v350_v47  ;;  %314 = vst.msk [vmem:[#allocation5 + $0x18] sm:$0xff] %vm310_vm1, %v4669_v51  ;;  %315 = vst.msk [vmem:[#allocation5 + $0x20] sm:$0xff] %vm310_vm1, %v4669_v51  ;;  %v116_v55 = vsub.s32 0, %v3910_v54  ;;  %v358_v58 = vsub.s32 1, %v3910_v54  ;;  %v477_v41 = vsub.s32 2, %v3910_v54  ;;  %s3792_s24 = smov 8  }
  0x49   :  { %3298 = vmatprep.mubr.msk.bf16.mxu1 %vm140_vm0, %v3115_v44  ;;  %316 = vst.msk [vmem:[#allocation5 + $0x28] sm:$0xff] %vm310_vm1, %v4669_v51  ;;  %317 = vst.msk [vmem:[#allocation5 + $0x30] sm:$0xff] %vm310_vm1, %v4669_v51  ;;  %vm277_vm5 = vcmask 7168   ;;  %s3793_s25 = smov 16   ;;  %s3794_s26 = smov 24   ;;  %vm2908_vm6 = vcmask 195584  }
  0x4a   :  { %318 = vst.msk [vmem:[#allocation5 + $0x38] sm:$0xff] %vm310_vm1, %v4669_v51  ;;  %319 = vst.msk [vmem:[#allocation5 + $0x40] sm:$0xff] %vm310_vm1, %v4669_v51  ;;  %v117_v57 = vrot.slane %v3916_v56, %v116_v55  ;;  %v359_v61 = vrot.slane %v3916_v56, %v358_v58  ;;  %v3973_v43 = vrot.slane %v3916_v56, %v477_v41 }
  0x4b   :  { %3305 = vmatpush3.bf16.msra.mxu0 %v3542_v45  ;;  %320 = vst.msk [vmem:[#allocation5 + $0x48] sm:$0xff] %vm310_vm1, %v4669_v51  ;;  %321 = vst.msk [vmem:[#allocation5 + $0x50] sm:$0xff] %vm310_vm1, %v4669_v51 }
  0x4c   :  { %3320 = vmatprep.subr.bf16.mxu0 %v4669_v51  ;;  %322 = vst.msk [vmem:[#allocation5 + $0x58] sm:$0xff] %vm310_vm1, %v4669_v51  ;;  %323 = vst.msk [vmem:[#allocation5 + $0x60] sm:$0xff] %vm310_vm1, %v4669_v51 }
  0x4d   :  { %324 = vst.msk [vmem:[#allocation5 + $0x68] sm:$0xff] %vm310_vm1, %v4669_v51  ;;  %325 = vst.msk [vmem:[#allocation5 + $0x70] sm:$0xff] %vm310_vm1, %v4669_v51 }
  0x4e   :  { %3307 = vmatmul.mubr.msk.bf16.vlgmr.msra.gmra.mxu0 %vm140_vm0, %v3124_v48  ;;  %326 = vst.msk [vmem:[#allocation5 + $0x78] sm:$0xff] %vm310_vm1, %v4669_v51 }
  0x4f   :  { %3310 = vmatprep.mubr.msk.bf16.mxu0 %vm140_vm0, %v3125_v50  ;;  %294 = vst.msk [vmem:[#allocation4] sm:$0xff] %vm277_vm5, %v4669_v51  ;;  %295 = vst.msk [vmem:[#allocation4 + $0x8] sm:$0xff] %vm277_vm5, %v4669_v51 }
  0x50   :  { %3299 = vmatmul.mubr.msk.bf16.gmra.mxu1 %vm140_vm0, %v3116_v49  ;;  %296 = vst.msk [vmem:[#allocation4 + $0x10] sm:$0xff] %vm277_vm5, %v4669_v51  ;;  %297 = vst.msk [vmem:[#allocation4 + $0x18] sm:$0xff] %vm277_vm5, %v4669_v51 }
  0x51   :  { %3316 = vmatprep.mubr.msk.bf16.mxu1 %vm3786_vm2, %v4669_v51  ;;  %298 = vst.msk [vmem:[#allocation4 + $0x20] sm:$0xff] %vm277_vm5, %v4669_v51  ;;  %299 = vst.msk [vmem:[#allocation4 + $0x28] sm:$0xff] %vm277_vm5, %v4669_v51 }
  0x52   :  { %300 = vst.msk [vmem:[#allocation4 + $0x30] sm:$0xff] %vm277_vm5, %v4669_v51  ;;  %301 = vst.msk [vmem:[#allocation4 + $0x38] sm:$0xff] %vm277_vm5, %v4669_v51 }
  0x53   :  { %302 = vst.msk [vmem:[#allocation4 + $0x40] sm:$0xff] %vm277_vm5, %v4669_v51  ;;  %303 = vst.msk [vmem:[#allocation4 + $0x48] sm:$0xff] %vm277_vm5, %v4669_v51 }
  0x54   :  { %304 = vst.msk [vmem:[#allocation4 + $0x50] sm:$0xff] %vm277_vm5, %v4669_v51  ;;  %305 = vst.msk [vmem:[#allocation4 + $0x58] sm:$0xff] %vm277_vm5, %v4669_v51 }
  0x55   :  { %306 = vst.msk [vmem:[#allocation4 + $0x60] sm:$0xff] %vm277_vm5, %v4669_v51  ;;  %307 = vst.msk [vmem:[#allocation4 + $0x68] sm:$0xff] %vm277_vm5, %v4669_v51 }
  0x56   :  { %3311 = vmatmul.mubr.msk.bf16.gmra.mxu0 %vm140_vm0, %v3126_v52  ;;  %308 = vst.msk [vmem:[#allocation4 + $0x70] sm:$0xff] %vm277_vm5, %v4669_v51  ;;  %309 = vst.msk [vmem:[#allocation4 + $0x78] sm:$0xff] %vm277_vm5, %v4669_v51 }
  0x57   :  { %3322 = vmatprep.mubr.msk.bf16.mxu0 %vm3786_vm2, %v4669_v51 }
 0x106   :  { %v3288_v59 = vpop.f32.mrf.mxu0 }
 0x107   :  { %v190_v60 = vadd.f32 %v3288_v59, %v117_v57 }
 0x108   :  { %v3296_v62 = vpop.f32.mrf.mxu1  ;;  %v181_v63 = vpop.f32.mrf.mxu0 }
 0x109   :  { %v3179_v0 = vpack.c.bf16 %v190_v60, %v190_v60  ;;  %v182_v1 = vadd.f32 %v181_v63, %v117_v57  ;;  %v448_v4 = vadd.f32 %v3296_v62, %v359_v61 }
 0x10a   :  { %v439_v2 = vpop.f32.mrf.mxu1  ;;  %v3289_v3 = vpop.f32.mrf.mxu0 }
 0x10b   :  { %263 = vst.msk [vmem:[#allocation2 + $0x8] sm:$0xf] %vm260_vm3, %v3179_v0  ;;  %v3177_v5 = vpack.c.bf16 %v182_v1, %v182_v1  ;;  %v193_v6 = vadd.f32 %v3289_v3, %v117_v57  ;;  %v440_v12 = vadd.f32 %v439_v2, %v359_v61 }
 0x10c   :  { %v3297_v7 = vpop.f32.mrf.mxu1  ;;  %v184_v8 = vpop.f32.mrf.mxu0 }
 0x10d   :  { %261 = vst.msk [vmem:[#allocation2] sm:$0xf] %vm260_vm3, %v3177_v5  ;;  %v3180_v9 = vpack.c.bf16 %v193_v6, %v193_v6  ;;  %v451_v10 = vadd.f32 %v3297_v7, %v359_v61  ;;  %v185_v11 = vadd.f32 %v184_v8, %v117_v57  ;;  %v197_v22 = vpack.c.bf16 %v193_v6, %v190_v60 }
 0x10e   :  { %v442_v13 = vpop.f32.mrf.mxu1  ;;  %v3963_v38 = vpop.f32.mrf.mxu0 }
 0x10f   :  { %264 = vst.msk [vmem:[#allocation2 + $0xc] sm:$0xf] %vm260_vm3, %v3180_v9  ;;  %v589_v14 = vpack.c.bf16 %v451_v10, %v448_v4  ;;  %v196_v15 = vpack.c.bf16 %v185_v11, %v182_v1  ;;  %v3178_v16 = vpack.c.bf16 %v185_v11, %v185_v11  ;;  %v443_v17 = vadd.f32 %v442_v13, %v359_v61 }
 0x110   :  { %v3300_v18 = vpop.f32.mrf.mxu1  ;;  %v3965_v39 = vpop.f32.mrf.mxu0 }
 0x111   :  { %262 = vst.msk [vmem:[#allocation2 + $0x4] sm:$0xf] %vm260_vm3, %v3178_v16  ;;  %v588_v19 = vpack.c.bf16 %v443_v17, %v440_v12  ;;  %598 = vrot.lane.b32.xlu1 %v589_v14, %s3787_s21  ;;  %v731_v20 = vsel %vm310_vm1, %v589_v14, 0  ;;  %200 = vrot.lane.b32.xlu0 %v196_v15, %s3787_s21  ;;  %v464_v23 = vadd.f32 %v3300_v18, %v359_v61 }
 0x112   :  { %v455_v21 = vpop.f32.mrf.mxu1  ;;  %3321 = vmatpush3.bf16.xpose.msra.mxu0 %v731_v20  ;;  %v666_v37 = vld [vmem:[#allocation2 + $0x8] sm:$0xf]  ;;  %v3967_v40 = vpop.f32.mrf.mxu0 }
 0x113   :  { %v685_v24 = vsel %vm310_vm1, %v588_v19, 0  ;;  %3332 = vmatprep.subr.bf16.mxu0 %v4669_v51  ;;  %v456_v28 = vadd.f32 %v455_v21, %v359_v61 }
 0x114   :  { %v3301_v25 = vpop.f32.mrf.mxu1  ;;  %3315 = vmatpush3.bf16.xpose.msra.mxu1 %v685_v24  ;;  %v664_v34 = vld [vmem:[#allocation2] sm:$0xf]  ;;  %v3970_v42 = vpop.f32.mrf.mxu0 }
 0x115   :  { %v467_v26 = vadd.f32 %v3301_v25, %v359_v61  ;;  %202 = vrot.lane.b32.xlu1 %v197_v22, %s3787_s21  ;;  %596 = vrot.lane.b32.xlu0 %v588_v19, %s3787_s21 }
 0x116   :  { %v458_v27 = vpop.f32.mrf.mxu1  ;;  %3326 = vmatprep.subr.bf16.mxu1 %v4669_v51  ;;  %v667_v36 = vld [vmem:[#allocation2 + $0xc] sm:$0xf]  ;;  %v3312_v44 = vpop.f32.mrf.mxu0 }
 0x117   :  { %v591_v29 = vpack.c.bf16 %v467_v26, %v464_v23  ;;  %v459_v30 = vadd.f32 %v458_v27, %v359_v61  ;;  %v582_v45 = vadd.f32 %v3312_v44, %v3973_v43 }
 0x118   :  { %v665_v31 = vld [vmem:[#allocation2 + $0x4] sm:$0xf]  ;;  %v573_v46 = vpop.f32.mrf.mxu0 }
 0x119   :  { %v590_v32 = vpack.c.bf16 %v459_v30, %v456_v28  ;;  %602 = vrot.lane.b32.xlu1 %v591_v29, %s3787_s21  ;;  %3323 = vmatmul.mubr.msk.bf16.vlgmr.msra.gmra.mxu0 %vm310_vm1, %v665_v31  ;;  %v823_v33 = vsel %vm310_vm1, %v591_v29, 0  ;;  %v574_v47 = vadd.f32 %v573_v46, %v3973_v43 }
 0x11a   :  { %3333 = vmatpush3.bf16.xpose.msra.mxu0 %v823_v33  ;;  %3334 = vmatprep.mubr.msk.bf16.mxu0 %vm3786_vm2, %v4669_v51  ;;  %v3313_v48 = vpop.f32.mrf.mxu0 }
 0x11b   :  { %3317 = vmatmul.mubr.msk.bf16.vlgmr.msra.gmra.mxu1 %vm310_vm1, %v664_v34  ;;  %600 = vrot.lane.b32.xlu0 %v590_v32, %s3787_s21  ;;  %v777_v35 = vsel %vm310_vm1, %v590_v32, 0  ;;  %v585_v49 = vadd.f32 %v3313_v48, %v3973_v43  ;;  %v566_v48 = vadd.f32 %v3963_v38, %v3973_v43 }
 0x11c   :  { %3327 = vmatpush3.bf16.xpose.msra.mxu1 %v777_v35  ;;  %3328 = vmatprep.mubr.msk.bf16.mxu1 %vm3786_vm2, %v4669_v51  ;;  %v576_v50 = vpop.f32.mrf.mxu0 }
 0x11d   :  { %604 = vrot.lane.b32.xlu1 %v588_v19, %s3788_s22  ;;  %3344 = vmatprep.subr.bf16.mxu0 %v4669_v51  ;;  %v3978_v52 = vpack.c.bf16 %v585_v49, %v582_v45  ;;  %v577_v53 = vadd.f32 %v576_v50, %v3973_v43  ;;  %v569_v49 = vadd.f32 %v3967_v40, %v3973_v43 }
 0x11e   :  { %3338 = vmatprep.subr.bf16.mxu1 %v4669_v51 }
 0x11f   :  { %204 = vrot.lane.b32.xlu0 %v196_v15, %s3788_s22  ;;  %v3981_v55 = vpack.c.bf16 %v577_v53, %v574_v47  ;;  %v558_v53 = vadd.f32 %v3965_v39, %v3973_v43  ;;  %v4057_v38 = vpack.c.bf16 %v569_v49, %v566_v48 }
 0x121   :  { %206 = vrot.lane.b32.xlu1 %v197_v22, %s3788_s22  ;;  %3335 = vmatmul.mubr.msk.bf16.vlgmr.msra.gmra.mxu0 %vm310_vm1, %v667_v36 }
 0x122   :  { %3346 = vmatprep.mubr.msk.bf16.mxu0 %vm3786_vm2, %v4669_v51 }
 0x123   :  { %3329 = vmatmul.mubr.msk.bf16.vlgmr.msra.gmra.mxu1 %vm310_vm1, %v666_v37  ;;  %606 = vrot.lane.b32.xlu0 %v589_v14, %s3788_s22 }
 0x124   :  { %3340 = vmatprep.mubr.msk.bf16.mxu1 %vm3786_vm2, %v4669_v51 }
 0x125   :  { %610 = vrot.lane.b32.xlu1 %v591_v29, %s3788_s22 }
 0x127   :  { %608 = vrot.lane.b32.xlu0 %v590_v32, %s3788_s22 }
 0x129   :  { %612 = vrot.lane.b32.xlu1 %v588_v19, %s3789_s23 }
 0x12b   :  { %208 = vrot.lane.b32.xlu0 %v196_v15, %s3789_s23 }
 0x12d   :  { %210 = vrot.lane.b32.xlu1 %v197_v22, %s3789_s23 }
 0x12f   :  { %614 = vrot.lane.b32.xlu0 %v589_v14, %s3789_s23 }
 0x131   :  { %618 = vrot.lane.b32.xlu1 %v591_v29, %s3789_s23 }
 0x133   :  { %616 = vrot.lane.b32.xlu0 %v590_v32, %s3789_s23 }
 0x183   :  { %v599_v57 = vpop.permute.xlu1 %598  ;;  %v201_v58 = vpop.permute.xlu0 %200 }
 0x184   :  { %v915_v56 = vsel %vm310_vm1, %v599_v57, 0  ;;  %v3101_v59 = vcombine.low %v201_v58, %v201_v58  ;;  %v3102_v60 = vcombine.high %v201_v58, %v201_v58  ;;  %v561_v57 = vadd.f32 %v3970_v42, %v3973_v43 }
 0x185   :  { %3345 = vmatpush3.bf16.xpose.msra.mxu0 %v915_v56 }
 0x186   :  { %265 = vst.msk [vmem:[#allocation2 + $0x10] sm:$0xf] %vm260_vm3, %v3101_v59  ;;  %266 = vst.msk [vmem:[#allocation2 + $0x14] sm:$0xf] %vm260_vm3, %v3102_v60  ;;  %3356 = vmatprep.subr.bf16.mxu0 %v4669_v51  ;;  %v4059_v58 = vpack.c.bf16 %v561_v57, %v558_v53 }
 0x187   :  { %v203_v61 = vpop.permute.xlu1 %202  ;;  %v597_v62 = vpop.permute.xlu0 %596 }
 0x188   :  { %v3103_v63 = vcombine.low %v203_v61, %v203_v61  ;;  %v3104_v0 = vcombine.high %v203_v61, %v203_v61  ;;  %v869_v1 = vsel %vm310_vm1, %v597_v62, 0 }
 0x189   :  { %3339 = vmatpush3.bf16.xpose.msra.mxu1 %v869_v1  ;;  %v3790_v1 = vmov -inf  }
 0x18a   :  { %267 = vst.msk [vmem:[#allocation2 + $0x18] sm:$0xf] %vm260_vm3, %v3103_v63  ;;  %268 = vst.msk [vmem:[#allocation2 + $0x1c] sm:$0xf] %vm260_vm3, %v3104_v0  ;;  %3350 = vmatprep.subr.bf16.mxu1 %v4669_v51 }
 0x18b   :  { %v603_v2 = vpop.permute.xlu1 %602  ;;  %279 = vst.msk [vmem:[#allocation3 + $0x8] sm:$0xff] %vm277_vm5, %v3790_v1  ;;  %278 = vst.msk [vmem:[#allocation3] sm:$0xff] %vm277_vm5, %v3790_v1 }
 0x18c   :  { %v1007_v5 = vsel %vm310_vm1, %v603_v2, 0  ;;  %280 = vst.msk [vmem:[#allocation3 + $0x10] sm:$0xff] %vm277_vm5, %v3790_v1  ;;  %281 = vst.msk [vmem:[#allocation3 + $0x18] sm:$0xff] %vm277_vm5, %v3790_v1 }
 0x18d   :  { %v601_v3 = vpop.permute.xlu0 %600  ;;  %v669_v4 = vld [vmem:[#allocation2 + $0x14] sm:$0xf]  ;;  %v668_v7 = vld [vmem:[#allocation2 + $0x10] sm:$0xf]  ;;  %282 = vst.msk [vmem:[#allocation3 + $0x20] sm:$0xff] %vm277_vm5, %v3790_v1  ;;  %283 = vst.msk [vmem:[#allocation3 + $0x28] sm:$0xff] %vm277_vm5, %v3790_v1 }
 0x18e   :  { %3347 = vmatmul.mubr.msk.bf16.vlgmr.msra.gmra.mxu0 %vm310_vm1, %v669_v4  ;;  %v961_v8 = vsel %vm310_vm1, %v601_v3, 0  ;;  %284 = vst.msk [vmem:[#allocation3 + $0x30] sm:$0xff] %vm277_vm5, %v3790_v1  ;;  %285 = vst.msk [vmem:[#allocation3 + $0x38] sm:$0xff] %vm277_vm5, %v3790_v1 }
 0x18f   :  { %v605_v6 = vpop.permute.xlu1 %604  ;;  %3357 = vmatpush3.bf16.xpose.msra.mxu0 %v1007_v5  ;;  %3358 = vmatprep.mubr.msk.bf16.mxu0 %vm3786_vm2, %v4669_v51  ;;  %286 = vst.msk [vmem:[#allocation3 + $0x40] sm:$0xff] %vm277_vm5, %v3790_v1  ;;  %287 = vst.msk [vmem:[#allocation3 + $0x48] sm:$0xff] %vm277_vm5, %v3790_v1 }
 0x190   :  { %3341 = vmatmul.mubr.msk.bf16.vlgmr.msra.gmra.mxu1 %vm310_vm1, %v668_v7  ;;  %3368 = vmatprep.subr.bf16.mxu0 %v4669_v51  ;;  %v1053_v20 = vsel %vm310_vm1, %v605_v6, 0  ;;  %288 = vst.msk [vmem:[#allocation3 + $0x50] sm:$0xff] %vm277_vm5, %v3790_v1  ;;  %289 = vst.msk [vmem:[#allocation3 + $0x58] sm:$0xff] %vm277_vm5, %v3790_v1 }
 0x191   :  { %v205_v9 = vpop.permute.xlu0 %204  ;;  %3351 = vmatpush3.bf16.xpose.msra.mxu1 %v961_v8  ;;  %3352 = vmatprep.mubr.msk.bf16.mxu1 %vm3786_vm2, %v4669_v51  ;;  %v671_v16 = vld [vmem:[#allocation2 + $0x1c] sm:$0xf]  ;;  %v670_v19 = vld [vmem:[#allocation2 + $0x18] sm:$0xf]  ;;  %290 = vst.msk [vmem:[#allocation3 + $0x60] sm:$0xff] %vm277_vm5, %v3790_v1  ;;  %291 = vst.msk [vmem:[#allocation3 + $0x68] sm:$0xff] %vm277_vm5, %v3790_v1 }
 0x192   :  { %v3105_v10 = vcombine.low %v205_v9, %v205_v9  ;;  %v3106_v11 = vcombine.high %v205_v9, %v205_v9  ;;  %3362 = vmatprep.subr.bf16.mxu1 %v4669_v51  ;;  %292 = vst.msk [vmem:[#allocation3 + $0x70] sm:$0xff] %vm277_vm5, %v3790_v1  ;;  %293 = vst.msk [vmem:[#allocation3 + $0x78] sm:$0xff] %vm277_vm5, %v3790_v1  ;;  %v4161_v49 = vld [vmem:[#allocation3] sm:$0xff] }
 0x193   :  { %v207_v12 = vpop.permute.xlu1 %206 }
 0x194   :  { %269 = vst.msk [vmem:[#allocation2 + $0x20] sm:$0xf] %vm260_vm3, %v3105_v10  ;;  %270 = vst.msk [vmem:[#allocation2 + $0x24] sm:$0xf] %vm260_vm3, %v3106_v11  ;;  %v3107_v13 = vcombine.low %v207_v12, %v207_v12  ;;  %v3108_v14 = vcombine.high %v207_v12, %v207_v12 }
 0x195   :  { %v607_v15 = vpop.permute.xlu0 %606 }
 0x196   :  { %271 = vst.msk [vmem:[#allocation2 + $0x28] sm:$0xf] %vm260_vm3, %v3107_v13  ;;  %272 = vst.msk [vmem:[#allocation2 + $0x2c] sm:$0xf] %vm260_vm3, %v3108_v14  ;;  %v1099_v17 = vsel %vm310_vm1, %v607_v15, 0  ;;  %3359 = vmatmul.mubr.msk.bf16.vlgmr.msra.gmra.mxu0 %vm310_vm1, %v671_v16  ;;  %v3791_v13 = vmov 0  }
 0x197   :  { %v611_v18 = vpop.permute.xlu1 %610  ;;  %3369 = vmatpush3.bf16.xpose.msra.mxu0 %v1099_v17  ;;  %3370 = vmatprep.mubr.msk.bf16.mxu0 %vm3786_vm2, %v4669_v51 }
 0x198   :  { %3353 = vmatmul.mubr.msk.bf16.vlgmr.msra.gmra.mxu1 %vm310_vm1, %v670_v19  ;;  %3380 = vmatprep.subr.bf16.mxu0 %v4669_v51  ;;  %v1191_v25 = vsel %vm310_vm1, %v611_v18, 0 }
 0x199   :  { %v609_v21 = vpop.permute.xlu0 %608  ;;  %3363 = vmatpush3.bf16.xpose.msra.mxu1 %v1053_v20  ;;  %3364 = vmatprep.mubr.msk.bf16.mxu1 %vm3786_vm2, %v4669_v51 }
 0x19a   :  { %3374 = vmatprep.subr.bf16.mxu1 %v4669_v51  ;;  %v1145_v30 = vsel %vm310_vm1, %v609_v21, 0  ;;  %3533 = vset.pattern.permute.xlu1 %v3791_v13 }
 0x19b   :  { %v613_v22 = vpop.permute.xlu1 %612  ;;  %v673_v24 = vld [vmem:[#allocation2 + $0x24] sm:$0xf]  ;;  %v672_v29 = vld [vmem:[#allocation2 + $0x20] sm:$0xf]  ;;  %3534 = vset.pattern.permute.xlu0 %v3791_v13  ;;  %v4194_v13 = vld [vmem:[#allocation3 + $0x18] sm:$0xff] }
 0x19c   :  { %v1237_v37 = vsel %vm310_vm1, %v613_v22, 0 }
 0x19d   :  { %v209_v23 = vpop.permute.xlu0 %208  ;;  %v675_v34 = vld [vmem:[#allocation2 + $0x2c] sm:$0xf]  ;;  %v674_v36 = vld [vmem:[#allocation2 + $0x28] sm:$0xf] }
 0x19e   :  { %v3109_v26 = vcombine.low %v209_v23, %v209_v23  ;;  %v3110_v27 = vcombine.high %v209_v23, %v209_v23  ;;  %3371 = vmatmul.mubr.msk.bf16.vlgmr.msra.gmra.mxu0 %vm310_vm1, %v673_v24 }
 0x19f   :  { %v211_v28 = vpop.permute.xlu1 %210  ;;  %3381 = vmatpush3.bf16.xpose.msra.mxu0 %v1191_v25  ;;  %3382 = vmatprep.mubr.msk.bf16.mxu0 %vm3786_vm2, %v4669_v51 }
 0x1a0   :  { %273 = vst.msk [vmem:[#allocation2 + $0x30] sm:$0xf] %vm260_vm3, %v3109_v26  ;;  %274 = vst.msk [vmem:[#allocation2 + $0x34] sm:$0xf] %vm260_vm3, %v3110_v27  ;;  %v3111_v31 = vcombine.low %v211_v28, %v211_v28  ;;  %v3112_v32 = vcombine.high %v211_v28, %v211_v28  ;;  %3365 = vmatmul.mubr.msk.bf16.vlgmr.msra.gmra.mxu1 %vm310_vm1, %v672_v29  ;;  %3392 = vmatprep.subr.bf16.mxu0 %v4669_v51 }
 0x1a1   :  { %3375 = vmatpush3.bf16.xpose.msra.mxu1 %v1145_v30  ;;  %3376 = vmatprep.mubr.msk.bf16.mxu1 %vm3786_vm2, %v4669_v51  ;;  %v615_v33 = vpop.permute.xlu0 %614 }
 0x1a2   :  { %275 = vst.msk [vmem:[#allocation2 + $0x38] sm:$0xf] %vm260_vm3, %v3111_v31  ;;  %276 = vst.msk [vmem:[#allocation2 + $0x3c] sm:$0xf] %vm260_vm3, %v3112_v32  ;;  %3386 = vmatprep.subr.bf16.mxu1 %v4669_v51  ;;  %v1283_v35 = vsel %vm310_vm1, %v615_v33, 0 }
 0x1a3   :  { %v619_v41 = vpop.permute.xlu1 %618 }
 0x1a4   :  { %v1375_v46 = vsel %vm310_vm1, %v619_v41, 0 }
 0x1a5   :  { %v617_v44 = vpop.permute.xlu0 %616 }
 0x1a6   :  { %3383 = vmatmul.mubr.msk.bf16.vlgmr.msra.gmra.mxu0 %vm310_vm1, %v675_v34  ;;  %v1329_v50 = vsel %vm310_vm1, %v617_v44, 0 }
 0x1a7   :  { %3393 = vmatpush3.bf16.xpose.msra.mxu0 %v1283_v35  ;;  %3394 = vmatprep.mubr.msk.bf16.mxu0 %vm3786_vm2, %v4669_v51  ;;  %v677_v45 = vld [vmem:[#allocation2 + $0x34] sm:$0xf]  ;;  %v676_v47 = vld [vmem:[#allocation2 + $0x30] sm:$0xf] }
 0x1a8   :  { %3377 = vmatmul.mubr.msk.bf16.vlgmr.msra.gmra.mxu1 %vm310_vm1, %v674_v36  ;;  %3404 = vmatprep.subr.bf16.mxu0 %v4669_v51 }
 0x1a9   :  { %3387 = vmatpush3.bf16.xpose.msra.mxu1 %v1237_v37  ;;  %3388 = vmatprep.mubr.msk.bf16.mxu1 %vm3786_vm2, %v4669_v51  ;;  %v679_v40 = vld [vmem:[#allocation2 + $0x3c] sm:$0xf]  ;;  %v678_v56 = vld [vmem:[#allocation2 + $0x38] sm:$0xf] }
 0x1aa   :  { %3398 = vmatprep.subr.bf16.mxu1 %v4669_v51 }
 0x1ae   :  { %3395 = vmatmul.mubr.msk.bf16.vlgmr.msra.gmra.mxu0 %vm310_vm1, %v677_v45 }
 0x1af   :  { %3405 = vmatpush3.bf16.xpose.msra.mxu0 %v1375_v46  ;;  %3406 = vmatprep.mubr.msk.bf16.mxu0 %vm3786_vm2, %v4669_v51  ;;  %v4159_v46 = vld [vmem:[#allocation3 + $0x8] sm:$0xff] }
 0x1b0   :  { %3389 = vmatmul.mubr.msk.bf16.vlgmr.msra.gmra.mxu1 %vm310_vm1, %v676_v47  ;;  %3416 = vmatprep.subr.bf16.mxu0 %v4669_v51 }
 0x1b1   :  { %3399 = vmatpush3.bf16.xpose.msra.mxu1 %v1329_v50  ;;  %3400 = vmatprep.mubr.msk.bf16.mxu1 %vm3786_vm2, %v4669_v51 }
 0x1b2   :  { %3410 = vmatprep.subr.bf16.mxu1 %v4669_v51 }
 0x1b6   :  { %3407 = vmatmul.mubr.msk.bf16.vlgmr.msra.gmra.mxu0 %vm310_vm1, %v679_v40 }
 0x1b7   :  { %3417 = vmatpush3.bf16.msra.mxu0 %v4057_v38  ;;  %3418 = vmatprep.mubr.msk.bf16.mxu0 %vm3786_vm2, %v4669_v51 }
 0x1b8   :  { %3401 = vmatmul.mubr.msk.bf16.vlgmr.msra.gmra.mxu1 %vm310_vm1, %v678_v56  ;;  %3428 = vmatprep.subr.bf16.mxu0 %v4669_v51 }
 0x1b9   :  { %3411 = vmatpush3.bf16.msra.mxu1 %v4059_v58  ;;  %3412 = vmatprep.mubr.msk.bf16.mxu1 %vm3786_vm2, %v4669_v51 }
 0x1ba   :  { %3422 = vmatprep.subr.bf16.mxu1 %v4669_v51 }
 0x1d9   :  { %v4071_v39 = vpop.f32.mrf.mxu0 }
 0x1da   :  { %v1437_v42 = vsel %vm1433_vm4, %v4071_v39, -inf }
 0x1db   :  { %v4075_v43 = vpop.f32.mrf.mxu1  ;;  %v3324_v59 = vpop.f32.mrf.mxu0  ;;  %1438 = vmax.xlane.f32.xlu1 %v1437_v42 }
 0x1dc   :  { %v1434_v60 = vsel %vm1433_vm4, %v4075_v43, -inf }
 0x1dd   :  { %v3318_v61 = vpop.f32.mrf.mxu1  ;;  %1435 = vmax.xlane.f32.xlu0 %v1434_v60  ;;  %v770_v62 = vpop.f32.mrf.mxu0 }
 0x1de   :  { %v4337_v62 = vld [vmem:[#allocation3 + $0x50] sm:$0xff] }
 0x1df   :  { %v724_v63 = vpop.f32.mrf.mxu1  ;;  %v3325_v0 = vpop.f32.mrf.mxu0 }
 0x1e1   :  { %v3319_v2 = vpop.f32.mrf.mxu1  ;;  %v4127_v3 = vpop.f32.mrf.mxu0 }
 0x1e2   :  { %v1443_v11 = vsel %vm1433_vm4, %v4127_v3, -inf }
 0x1e3   :  { %v4129_v4 = vpop.f32.mrf.mxu1  ;;  %v3336_v5 = vpop.f32.mrf.mxu0 }
 0x1e4   :  { %v1440_v6 = vsel %vm1433_vm4, %v4129_v4, -inf  ;;  %v4183_v5 = vld [vmem:[#allocation3 + $0x10] sm:$0xff] }
 0x1e5   :  { %v3330_v7 = vpop.f32.mrf.mxu1  ;;  %1441 = vmax.xlane.f32.xlu0 %v1440_v6  ;;  %v862_v8 = vpop.f32.mrf.mxu0 }
 0x1e7   :  { %v816_v9 = vpop.f32.mrf.mxu1  ;;  %v3337_v10 = vpop.f32.mrf.mxu0 }
 0x1e9   :  { %v3331_v12 = vpop.f32.mrf.mxu1  ;;  %1444 = vmax.xlane.f32.xlu0 %v1443_v11 }
 0x24e   :  { %v4135_v14 = vpop.f32.mrf.mxu0 }
 0x24f   :  { %v1449_v15 = vsel %vm1433_vm4, %v4135_v14, -inf }
 0x250   :  { %1450 = vmax.xlane.f32.xlu0 %v1449_v15  ;;  %v4139_v16 = vpop.f32.mrf.mxu1  ;;  %v3348_v17 = vpop.f32.mrf.mxu0 }
 0x251   :  { %v1446_v18 = vsel %vm1433_vm4, %v4139_v16, -inf }
 0x252   :  { %v954_v19 = vpop.f32.mrf.mxu0  ;;  %1447 = vmax.xlane.f32.xlu1 %v1446_v18  ;;  %v3342_v20 = vpop.f32.mrf.mxu1 }
 0x254   :  { %v908_v21 = vpop.f32.mrf.mxu1  ;;  %v3349_v22 = vpop.f32.mrf.mxu0 }
 0x256   :  { %v3343_v23 = vpop.f32.mrf.mxu1  ;;  %v4143_v24 = vpop.f32.mrf.mxu0 }
 0x257   :  { %v1455_v25 = vsel %vm1433_vm4, %v4143_v24, -inf }
 0x258   :  { %1456 = vmax.xlane.f32.xlu0 %v1455_v25  ;;  %v4147_v26 = vpop.f32.mrf.mxu1  ;;  %v3360_v27 = vpop.f32.mrf.mxu0 }
 0x259   :  { %v1452_v28 = vsel %vm1433_vm4, %v4147_v26, -inf }
 0x25a   :  { %v1046_v29 = vpop.f32.mrf.mxu0  ;;  %1453 = vmax.xlane.f32.xlu1 %v1452_v28  ;;  %v3354_v30 = vpop.f32.mrf.mxu1 }
 0x25c   :  { %v1000_v31 = vpop.f32.mrf.mxu1  ;;  %v3361_v32 = vpop.f32.mrf.mxu0 }
 0x25e   :  { %v3355_v33 = vpop.f32.mrf.mxu1  ;;  %v4151_v34 = vpop.f32.mrf.mxu0 }
 0x25f   :  { %v1461_v35 = vsel %vm1433_vm4, %v4151_v34, -inf }
 0x260   :  { %v4155_v36 = vpop.f32.mrf.mxu1  ;;  %1462 = vmax.xlane.f32.xlu0 %v1461_v35  ;;  %v3372_v37 = vpop.f32.mrf.mxu0 }
 0x261   :  { %v1458_v41 = vsel %vm1433_vm4, %v4155_v36, -inf }
 0x262   :  { %1459 = vmax.xlane.f32.xlu1 %v1458_v41  ;;  %v3366_v44 = vpop.f32.mrf.mxu1  ;;  %v1138_v45 = vpop.f32.mrf.mxu0 }
 0x264   :  { %v1439_v47 = vpop.xlane.xlu1 %1438  ;;  %v1092_v48 = vpop.f32.mrf.mxu1 }
 0x265   :  { %v4164_v50 = vmax.f32 %v4159_v46, %v1439_v47  ;;  %v3373_v53 = vpop.f32.mrf.mxu0  ;;  %v4225_v48 = vld [vmem:[#allocation3 + $0x28] sm:$0xff] }
 0x266   :  { %v1436_v57 = vpop.xlane.xlu0 %1435  ;;  %v3367_v40 = vpop.f32.mrf.mxu1 }
 0x267   :  { %2668 = vst.msk [vmem:[#allocation3 + $0x8] sm:$0xff] %vm277_vm5, %v4164_v50  ;;  %v4171_v42 = vmax.f32 %v4161_v49, %v1436_v57  ;;  %v4173_v59 = vpop.f32.mrf.mxu0  ;;  %v4227_v57 = vld [vmem:[#allocation3 + $0x20] sm:$0xff] }
 0x268   :  { %v1467_v60 = vsel %vm1433_vm4, %v4173_v59, -inf  ;;  %v4177_v61 = vpop.f32.mrf.mxu1 }
 0x269   :  { %2667 = vst.msk [vmem:[#allocation3] sm:$0xff] %vm277_vm5, %v4171_v42  ;;  %1468 = vmax.xlane.f32.xlu0 %v1467_v60  ;;  %v3384_v63 = vpop.f32.mrf.mxu0  ;;  %v1464_v44 = vsel %vm1433_vm4, %v4177_v61, -inf }
 0x26a   :  { %v3378_v0 = vpop.f32.mrf.mxu1 }
 0x26b   :  { %v1230_v1 = vpop.f32.mrf.mxu0 }
 0x26c   :  { %v1184_v2 = vpop.f32.mrf.mxu1 }
 0x26d   :  { %v3385_v6 = vpop.f32.mrf.mxu0  ;;  %v4244_v2 = vld [vmem:[#allocation3 + $0x38] sm:$0xff] }
 0x26e   :  { %v1442_v7 = vpop.xlane.xlu0 %1441  ;;  %v3379_v8 = vpop.f32.mrf.mxu1 }
 0x26f   :  { %v4186_v9 = vmax.f32 %v4183_v5, %v1442_v7  ;;  %v4188_v10 = vpop.f32.mrf.mxu0  ;;  %v4246_v7 = vld [vmem:[#allocation3 + $0x30] sm:$0xff] }
 0x270   :  { %v4190_v11 = vpop.f32.mrf.mxu1  ;;  %v1473_v12 = vsel %vm1433_vm4, %v4188_v10, -inf }
 0x271   :  { %2669 = vst.msk [vmem:[#allocation3 + $0x10] sm:$0xff] %vm277_vm5, %v4186_v9  ;;  %1474 = vmax.xlane.f32.xlu0 %v1473_v12  ;;  %v3396_v17 = vpop.f32.mrf.mxu0  ;;  %v1470_v45 = vsel %vm1433_vm4, %v4190_v11, -inf }
 0x272   :  { %v1445_v18 = vpop.xlane.xlu0 %1444  ;;  %v3390_v19 = vpop.f32.mrf.mxu1 }
 0x273   :  { %v4201_v20 = vmax.f32 %v4194_v13, %v1445_v18  ;;  %v1322_v21 = vpop.f32.mrf.mxu0  ;;  %1548 = vperm.xlu1 %3533, %v4171_v42  }
 0x274   :  { %v1276_v22 = vpop.f32.mrf.mxu1  ;;  %v4264_v21 = vld [vmem:[#allocation3 + $0x48] sm:$0xff] }
 0x275   :  { %2670 = vst.msk [vmem:[#allocation3 + $0x18] sm:$0xff] %vm277_vm5, %v4201_v20  ;;  %v3397_v25 = vpop.f32.mrf.mxu0 }
 0x276   :  { %v3391_v27 = vpop.f32.mrf.mxu1  ;;  %v4266_v25 = vld [vmem:[#allocation3 + $0x40] sm:$0xff] }
 0x277   :  { %v4208_v28 = vpop.f32.mrf.mxu0 }
 0x278   :  { %v1479_v29 = vsel %vm1433_vm4, %v4208_v28, -inf  ;;  %v4212_v30 = vpop.f32.mrf.mxu1 }
 0x279   :  { %1480 = vmax.xlane.f32.xlu0 %v1479_v29  ;;  %v3408_v31 = vpop.f32.mrf.mxu0  ;;  %v1476_v47 = vsel %vm1433_vm4, %v4212_v30, -inf }
 0x27a   :  { %v3402_v32 = vpop.f32.mrf.mxu1 }
 0x27b   :  { %v1414_v33 = vpop.f32.mrf.mxu0 }
 0x27c   :  { %v1368_v35 = vpop.f32.mrf.mxu1 }
 0x27d   :  { %v3409_v37 = vpop.f32.mrf.mxu0 }
 0x27e   :  { %v3403_v41 = vpop.f32.mrf.mxu1 }
 0x27f   :  { %v4285_v41 = vld [vmem:[#allocation3 + $0x58] sm:$0xff] }
 0x28f   :  { %1553 = vperm.xlu0 %3534, %v4164_v50  }
 0x293   :  { %628 = vrot.lane.b32.xlu0 %v4059_v58, %s3787_s21 }
 0x297   :  { %1465 = vmax.xlane.f32.xlu1 %v1464_v44 }
 0x29b   :  { %1471 = vmax.xlane.f32.xlu1 %v1470_v45 }
 0x29f   :  { %1477 = vmax.xlane.f32.xlu1 %v1476_v47 }
 0x2b0   :  { %1558 = vperm.xlu1 %3533, %v4186_v9  }
 0x2b4   :  { %1563 = vperm.xlu1 %3533, %v4201_v20  }
 0x2d9   :  { %v1451_v53 = vpop.xlane.xlu0 %1450 }
 0x2da   :  { %v4230_v40 = vmax.f32 %v4225_v48, %v1451_v53 }
 0x2db   :  { %v1448_v60 = vpop.xlane.xlu1 %1447 }
 0x2dc   :  { %2672 = vst.msk [vmem:[#allocation3 + $0x28] sm:$0xff] %vm277_vm5, %v4230_v40  ;;  %v4237_v0 = vmax.f32 %v4227_v57, %v1448_v60 }
 0x2de   :  { %2671 = vst.msk [vmem:[#allocation3 + $0x20] sm:$0xff] %vm277_vm5, %v4237_v0  ;;  %1568 = vperm.xlu1 %3533, %v4237_v0  }
 0x2e1   :  { %v1457_v6 = vpop.xlane.xlu0 %1456 }
 0x2e2   :  { %v4249_v8 = vmax.f32 %v4244_v2, %v1457_v6  ;;  %1573 = vperm.xlu1 %3533, %v4230_v40  }
 0x2e3   :  { %v1454_v12 = vpop.xlane.xlu1 %1453 }
 0x2e4   :  { %2674 = vst.msk [vmem:[#allocation3 + $0x38] sm:$0xff] %vm277_vm5, %v4249_v8  ;;  %v4257_v18 = vmax.f32 %v4246_v7, %v1454_v12 }
 0x2e6   :  { %2673 = vst.msk [vmem:[#allocation3 + $0x30] sm:$0xff] %vm277_vm5, %v4257_v18  ;;  %1578 = vperm.xlu1 %3533, %v4257_v18  }
 0x2e9   :  { %v1463_v22 = vpop.xlane.xlu0 %1462 }
 0x2ea   :  { %v4269_v27 = vmax.f32 %v4264_v21, %v1463_v22  ;;  %1583 = vperm.xlu1 %3533, %v4249_v8  }
 0x2eb   :  { %v1460_v29 = vpop.xlane.xlu1 %1459 }
 0x2ec   :  { %2676 = vst.msk [vmem:[#allocation3 + $0x48] sm:$0xff] %vm277_vm5, %v4269_v27  ;;  %v4277_v32 = vmax.f32 %v4266_v25, %v1460_v29  ;;  %v4309_v29 = vld [vmem:[#allocation3 + $0x78] sm:$0xff] }
 0x2ee   :  { %2675 = vst.msk [vmem:[#allocation3 + $0x40] sm:$0xff] %vm277_vm5, %v4277_v32  ;;  %1588 = vperm.xlu1 %3533, %v4277_v32  }
 0x2ef   :  { %v1549_v35 = vpop.permute.xlu1 %1548 }
 0x2f0   :  { %v1626_v37 = vsub.f32 %v4075_v43, %v1549_v35  ;;  %v4297_v43 = vld [vmem:[#allocation3 + $0x68] sm:$0xff] }
 0x2f2   :  { %v1642_v44 = vpack.c.bf16 %v1626_v37, %v1626_v37  ;;  %v1469_v45 = vpop.xlane.xlu0 %1468  ;;  %1593 = vperm.xlu1 %3533, %v4269_v27  }
 0x2f3   :  { %v4289_v47 = vmax.f32 %v4285_v41, %v1469_v45 }
 0x2f4   :  { %v1659_v53 = vmul.bf16 1069105081, %v1642_v44 }
 0x2f5   :  { %2678 = vst.msk [vmem:[#allocation3 + $0x58] sm:$0xff] %vm277_vm5, %v4289_v47 }
 0x2f6   :  { %3545 = vpow.bf16 %v1659_v53  ;;  %630 = vrot.lane.b32.xlu1 %v4057_v38, %s3787_s21 }
 0x2fa   :  { %v1475_v6 = vpop.xlane.xlu0 %1474  ;;  %1603 = vperm.xlu1 %3533, %v4289_v47  }
 0x2fb   :  { %v4301_v12 = vmax.f32 %v4297_v43, %v1475_v6 }
 0x2fd   :  { %2680 = vst.msk [vmem:[#allocation3 + $0x68] sm:$0xff] %vm277_vm5, %v4301_v12 }
 0x2fe   :  { %634 = vrot.lane.b32.xlu1 %v3978_v52, %s3787_s21 }
 0x302   :  { %v1481_v35 = vpop.xlane.xlu0 %1480  ;;  %1613 = vperm.xlu1 %3533, %v4301_v12  }
 0x303   :  { %v4313_v37 = vmax.f32 %v4309_v29, %v1481_v35 }
 0x304   :  { %v4315_v44 = vpop.eup %3545 }
 0x305   :  { %2682 = vst.msk [vmem:[#allocation3 + $0x78] sm:$0xff] %vm277_vm5, %v4313_v37  ;;  %3413 = vmatmul.mubr.msk.bf16.vlgmr.msra.gmra.mxu1 %vm1433_vm4, %v4315_v44 }
 0x306   :  { %3423 = vmatpush3.bf16.msra.mxu1 %v3981_v55  ;;  %642 = vrot.lane.b32.xlu1 %v4057_v38, %s3788_s22 }
 0x307   :  { %3424 = vmatprep.mubr.msk.bf16.mxu1 %vm3786_vm2, %v4669_v51  ;;  %3434 = vmatprep.subr.bf16.mxu1 %v4669_v51 }
 0x30a   :  { %v1554_v53 = vpop.permute.xlu0 %1553  ;;  %1623 = vperm.xlu1 %3533, %v4313_v37  }
 0x30b   :  { %v1627_v6 = vsub.f32 %v4071_v39, %v1554_v53 }
 0x30d   :  { %v1643_v35 = vpack.c.bf16 %v1627_v6, %v1627_v6 }
 0x30e   :  { %646 = vrot.lane.b32.xlu1 %v3978_v52, %s3788_s22 }
 0x30f   :  { %v1662_v15 = vmul.bf16 1069105081, %v1643_v35  ;;  %v4360_v35 = vld [vmem:[#allocation3 + $0x70] sm:$0xff] }
 0x311   :  { %3547 = vpow.bf16 %v1662_v15 }
 0x312   :  { %654 = vrot.lane.b32.xlu1 %v4057_v38, %s3789_s23  ;;  %v4349_v38 = vld [vmem:[#allocation3 + $0x60] sm:$0xff] }
 0x316   :  { %658 = vrot.lane.b32.xlu1 %v3978_v52, %s3789_s23 }
 0x31f   :  { %v4339_v23 = vpop.eup %3547 }
 0x320   :  { %3419 = vmatmul.mubr.msk.bf16.vlgmr.msra.gmra.mxu0 %vm1433_vm4, %v4339_v23  ;;  %v1466_v39 = vpop.xlane.xlu1 %1465 }
 0x321   :  { %3429 = vmatpush3.bf16.msra.mxu0 %v3978_v52  ;;  %v4345_v53 = vmax.f32 %v4337_v62, %v1466_v39  ;;  %3430 = vmatprep.mubr.msk.bf16.mxu0 %vm3786_vm2, %v4669_v51 }
 0x322   :  { %3440 = vmatprep.subr.bf16.mxu0 %v4669_v51 }
 0x323   :  { %2677 = vst.msk [vmem:[#allocation3 + $0x50] sm:$0xff] %vm277_vm5, %v4345_v53  ;;  %1598 = vperm.xlu0 %3534, %v4345_v53  }
 0x324   :  { %v1472_v6 = vpop.xlane.xlu1 %1471 }
 0x325   :  { %v4358_v52 = vmax.f32 %v4349_v38, %v1472_v6 }
 0x327   :  { %2679 = vst.msk [vmem:[#allocation3 + $0x60] sm:$0xff] %vm277_vm5, %v4358_v52  ;;  %632 = vrot.lane.b32.xlu0 %v3981_v55, %s3787_s21 }
 0x328   :  { %v1478_v56 = vpop.xlane.xlu1 %1477 }
 0x329   :  { %v4369_v45 = vmax.f32 %v4360_v35, %v1478_v56 }
 0x32b   :  { %2681 = vst.msk [vmem:[#allocation3 + $0x70] sm:$0xff] %vm277_vm5, %v4369_v45  ;;  %1608 = vperm.xlu0 %3534, %v4358_v52  }
 0x32c   :  { %v1559_v6 = vpop.permute.xlu1 %1558 }
 0x32d   :  { %v1628_v60 = vsub.f32 %v4129_v4, %v1559_v6 }
 0x32f   :  { %v1644_v31 = vpack.c.bf16 %v1628_v60, %v1628_v60  ;;  %640 = vrot.lane.b32.xlu0 %v4059_v58, %s3788_s22 }
 0x330   :  { %v1564_v17 = vpop.permute.xlu1 %1563 }
 0x331   :  { %v1665_v19 = vmul.bf16 1069105081, %v1644_v31  ;;  %v1629_v56 = vsub.f32 %v4127_v3, %v1564_v17  ;;  %v629_v31 = vpop.permute.xlu0 %628 }
 0x333   :  { %3549 = vpow.bf16 %v1665_v19  ;;  %v1645_v1 = vpack.c.bf16 %v1629_v56, %v1629_v56  ;;  %1618 = vperm.xlu0 %3534, %v4369_v45  }
 0x335   :  { %v1668_v22 = vmul.bf16 1069105081, %v1645_v1 }
 0x337   :  { %3551 = vpow.bf16 %v1668_v22  ;;  %644 = vrot.lane.b32.xlu0 %v3981_v55, %s3788_s22 }
 0x33b   :  { %652 = vrot.lane.b32.xlu0 %v4059_v58, %s3789_s23 }
 0x33f   :  { %656 = vrot.lane.b32.xlu0 %v3981_v55, %s3789_s23 }
 0x341   :  { %v4387_v4 = vpop.eup %3549 }
 0x342   :  { %3425 = vmatmul.mubr.msk.bf16.vlgmr.msra.gmra.mxu1 %vm1433_vm4, %v4387_v4 }
 0x343   :  { %3435 = vmatpush3.bf16.msra.mxu1 %v629_v31  ;;  %3436 = vmatprep.mubr.msk.bf16.mxu1 %vm3786_vm2, %v4669_v51 }
 0x344   :  { %3446 = vmatprep.subr.bf16.mxu1 %v4669_v51 }
 0x345   :  { %v4394_v3 = vpop.eup %3551 }
 0x346   :  { %3431 = vmatmul.mubr.msk.bf16.vlgmr.msra.gmra.mxu0 %vm1433_vm4, %v4394_v3 }
 0x347   :  { %3442 = vmatprep.mubr.msk.bf16.mxu0 %vm3786_vm2, %v4669_v51 }
 0x359   :  { %v1569_v55 = vpop.permute.xlu1 %1568 }
 0x35a   :  { %v1630_v58 = vsub.f32 %v4139_v16, %v1569_v55 }
 0x35c   :  { %v1646_v1 = vpack.c.bf16 %v1630_v58, %v1630_v58 }
 0x35d   :  { %v1574_v17 = vpop.permute.xlu1 %1573 }
 0x35e   :  { %v1671_v19 = vmul.bf16 1069105081, %v1646_v1  ;;  %v1631_v60 = vsub.f32 %v4135_v14, %v1574_v17 }
 0x360   :  { %3553 = vpow.bf16 %v1671_v19  ;;  %v1647_v22 = vpack.c.bf16 %v1631_v60, %v1631_v60 }
 0x361   :  { %v1579_v6 = vpop.permute.xlu1 %1578 }
 0x362   :  { %v1674_v56 = vmul.bf16 1069105081, %v1647_v22  ;;  %v1632_v31 = vsub.f32 %v4147_v26, %v1579_v6  ;;  %v4671_v22 = vmov 0.0  }
 0x364   :  { %3555 = vpow.bf16 %v1674_v56  ;;  %v1648_v39 = vpack.c.bf16 %v1632_v31, %v1632_v31 }
 0x365   :  { %v1584_v15 = vpop.permute.xlu1 %1583 }
 0x366   :  { %v1677_v33 = vmul.bf16 1069105081, %v1648_v39  ;;  %v1633_v63 = vsub.f32 %v4143_v24, %v1584_v15 }
 0x368   :  { %3557 = vpow.bf16 %v1677_v33  ;;  %v1649_v51 = vpack.c.bf16 %v1633_v63, %v1633_v63 }
 0x369   :  { %v1589_v16 = vpop.permute.xlu1 %1588 }
 0x36a   :  { %v1680_v55 = vmul.bf16 1069105081, %v1649_v51  ;;  %v1634_v58 = vsub.f32 %v4155_v36, %v1589_v16 }
 0x36c   :  { %3559 = vpow.bf16 %v1680_v55  ;;  %v1650_v14 = vpack.c.bf16 %v1634_v58, %v1634_v58 }
 0x36d   :  { %v1594_v1 = vpop.permute.xlu1 %1593 }
 0x36e   :  { %v3554_v17 = vpop.eup %3553  ;;  %v1683_v19 = vmul.bf16 1069105081, %v1650_v14  ;;  %v1635_v60 = vsub.f32 %v4151_v34, %v1594_v1 }
 0x36f   :  { %3437 = vmatmul.mubr.msk.bf16.vlgmr.msra.gmra.mxu1 %vm1433_vm4, %v3554_v17  ;;  %v1742_v26 = vunpack.c.l.bf16 %v3554_v17 }
 0x370   :  { %3561 = vpow.bf16 %v1683_v19  ;;  %v1651_v39 = vpack.c.bf16 %v1635_v60, %v1635_v60  ;;  %3448 = vmatprep.mubr.msk.bf16.mxu1 %vm3786_vm2, %v4671_v22 }
 0x371   :  { %v631_v24 = vpop.permute.xlu1 %630  ;;  %v1766_v51 = vsel %vm1433_vm4, %v1742_v26, 0.0 }
 0x372   :  { %v3556_v63 = vpop.eup %3555  ;;  %v1686_v36 = vmul.bf16 1069105081, %v1651_v39  ;;  %1767 = vadd.xlane.f32.xlu0 %v1766_v51  ;;  %3441 = vmatpush3.bf16.msra.mxu0 %v631_v24 }
 0x373   :  { %v1743_v33 = vunpack.c.l.bf16 %v3556_v63  ;;  %3452 = vmatprep.subr.bf16.mxu0 %v4671_v22 }
 0x374   :  { %3563 = vpow.bf16 %v1686_v36 }
 0x375   :  { %v1604_v34 = vpop.permute.xlu1 %1603  ;;  %3443 = vmatmul.mubr.msk.bf16.vlgmr.msra.gmra.mxu0 %vm1433_vm4, %v3556_v63  ;;  %v1769_v15 = vsel %vm1433_vm4, %v1743_v33, 0.0 }
 0x376   :  { %v4413_v6 = vpop.eup %3557  ;;  %v1637_v56 = vsub.f32 %v4173_v59, %v1604_v34  ;;  %1770 = vadd.xlane.f32.xlu1 %v1769_v15  ;;  %3454 = vmatprep.mubr.msk.bf16.mxu0 %vm3786_vm2, %v4671_v22 }
 0x377   :  { %v1744_v31 = vunpack.c.l.bf16 %v4413_v6 }
 0x378   :  { %v1653_v16 = vpack.c.bf16 %v1637_v56, %v1637_v56 }
 0x379   :  { %v635_v55 = vpop.permute.xlu1 %634  ;;  %v1772_v58 = vsel %vm1433_vm4, %v1744_v31, 0.0 }
 0x37a   :  { %v3560_v14 = vpop.eup %3559  ;;  %v1692_v1 = vmul.bf16 1069105081, %v1653_v16  ;;  %1773 = vadd.xlane.f32.xlu0 %v1772_v58  ;;  %3453 = vmatpush3.bf16.msra.mxu0 %v635_v55 }
 0x37b   :  { %v1745_v17 = vunpack.c.l.bf16 %v3560_v14  ;;  %3464 = vmatprep.subr.bf16.mxu0 %v4671_v22 }
 0x37c   :  { %3565 = vpow.bf16 %v1692_v1 }
 0x37d   :  { %v1614_v19 = vpop.permute.xlu1 %1613  ;;  %3455 = vmatmul.mubr.msk.bf16.vlgmr.msra.gmra.mxu0 %vm1433_vm4, %v3560_v14  ;;  %v1775_v59 = vsel %vm1433_vm4, %v1745_v17, 0.0 }
 0x37e   :  { %v4423_v60 = vpop.eup %3561  ;;  %v1639_v26 = vsub.f32 %v4188_v10, %v1614_v19  ;;  %1776 = vadd.xlane.f32.xlu0 %v1775_v59  ;;  %3466 = vmatprep.mubr.msk.bf16.mxu0 %vm3786_vm2, %v4671_v22 }
 0x37f   :  { %v1746_v39 = vunpack.c.l.bf16 %v4423_v60 }
 0x380   :  { %v1655_v24 = vpack.c.bf16 %v1639_v26, %v1639_v26 }
 0x381   :  { %v643_v51 = vpop.permute.xlu1 %642  ;;  %v1778_v63 = vsel %vm1433_vm4, %v1746_v39, 0.0 }
 0x382   :  { %v3564_v36 = vpop.eup %3563  ;;  %v1698_v33 = vmul.bf16 1069105081, %v1655_v24  ;;  %1779 = vadd.xlane.f32.xlu1 %v1778_v63  ;;  %3465 = vmatpush3.bf16.msra.mxu0 %v643_v51  ;;  %v1739_v63 = vunpack.c.l.bf16 %v4339_v23 }
 0x383   :  { %v1747_v34 = vunpack.c.l.bf16 %v3564_v36  ;;  %3476 = vmatprep.subr.bf16.mxu0 %v4671_v22 }
 0x384   :  { %3567 = vpow.bf16 %v1698_v33 }
 0x385   :  { %v1624_v15 = vpop.permute.xlu1 %1623  ;;  %3467 = vmatmul.mubr.msk.bf16.vlgmr.msra.gmra.mxu0 %vm1433_vm4, %v3564_v36  ;;  %v1781_v10 = vsel %vm1433_vm4, %v1747_v34, 0.0 }
 0x386   :  { %v1641_v56 = vsub.f32 %v4208_v28, %v1624_v15  ;;  %1782 = vadd.xlane.f32.xlu0 %v1781_v10  ;;  %3478 = vmatprep.mubr.msk.bf16.mxu0 %vm3786_vm2, %v4671_v22  ;;  %v1757_v15 = vsel %vm1433_vm4, %v1739_v63, 0.0  ;;  %v1741_v10 = vunpack.c.l.bf16 %v4394_v3 }
 0x388   :  { %v1657_v31 = vpack.c.bf16 %v1641_v56, %v1641_v56 }
 0x389   :  { %v647_v16 = vpop.permute.xlu1 %646 }
 0x38a   :  { %v3566_v55 = vpop.eup %3565  ;;  %v1704_v58 = vmul.bf16 1069105081, %v1657_v31  ;;  %3477 = vmatpush3.bf16.msra.mxu0 %v647_v16  ;;  %v1763_v16 = vsel %vm1433_vm4, %v1741_v10, 0.0 }
 0x38b   :  { %3488 = vmatprep.subr.bf16.mxu0 %v4671_v22  ;;  %v1749_v14 = vunpack.c.l.bf16 %v3566_v55 }
 0x38c   :  { %3569 = vpow.bf16 %v1704_v58 }
 0x38d   :  { %v655_v1 = vpop.permute.xlu1 %654  ;;  %3479 = vmatmul.mubr.msk.bf16.vlgmr.msra.gmra.mxu0 %vm1433_vm4, %v3566_v55  ;;  %v1787_v17 = vsel %vm1433_vm4, %v1749_v14, 0.0  ;;  %v4672_v55 = vsub.f32 %v4225_v48, %v4230_v40  ;;  %v4674_v40 = vsub.f32 %v4337_v62, %v4345_v53  ;;  %v4676_v62 = vsub.f32 %v4360_v35, %v4369_v45 }
 0x38e   :  { %1788 = vadd.xlane.f32.xlu0 %v1787_v17  ;;  %3489 = vmatpush3.bf16.msra.mxu0 %v655_v1 }
 0x38f   :  { %3490 = vmatprep.mubr.msk.bf16.mxu0 %vm3786_vm2, %v4671_v22  ;;  %3500 = vmatprep.subr.bf16.mxu0 %v4671_v22  ;;  %v1524_v58 = vmul.f32 1.442695, %v4672_v55  ;;  %v1542_v53 = vmul.f32 1.442695, %v4676_v62 }
 0x391   :  { %v659_v59 = vpop.permute.xlu1 %658 }
 0x392   :  { %v3568_v28 = vpop.eup %3567 }
 0x393   :  { %v1751_v19 = vunpack.c.l.bf16 %v3568_v28 }
 0x395   :  { %3491 = vmatmul.mubr.msk.bf16.vlgmr.msra.gmra.mxu0 %vm1433_vm4, %v3568_v28  ;;  %v1793_v26 = vsel %vm1433_vm4, %v1751_v19, 0.0  ;;  %v1534_v19 = vmul.f32 1.442695, %v4674_v40 }
 0x396   :  { %3501 = vmatpush3.bf16.msra.mxu0 %v659_v59  ;;  %1794 = vadd.xlane.f32.xlu0 %v1793_v26 }
 0x397   :  { %3502 = vmatprep.mubr.msk.bf16.mxu0 %vm3786_vm2, %v4671_v22 }
 0x39a   :  { %v3570_v39 = vpop.eup %3569 }
 0x39b   :  { %v1753_v24 = vunpack.c.l.bf16 %v3570_v39 }
 0x39d   :  { %3503 = vmatmul.mubr.msk.bf16.vlgmr.msra.gmra.mxu0 %vm1433_vm4, %v3570_v39  ;;  %v1799_v51 = vsel %vm1433_vm4, %v1753_v24, 0.0 }
 0x39e   :  { %1800 = vadd.xlane.f32.xlu0 %v1799_v51  ;;  %v1599_v36 = vpop.permute.xlu0 %1598 }
 0x39f   :  { %v1636_v33 = vsub.f32 %v4177_v61, %v1599_v36 }
 0x3a1   :  { %v1652_v34 = vpack.c.bf16 %v1636_v33, %v1636_v33 }
 0x3a2   :  { %1758 = vadd.xlane.f32.xlu0 %v1757_v15  ;;  %v633_v56 = vpop.permute.xlu0 %632 }
 0x3a3   :  { %v1689_v31 = vmul.bf16 1069105081, %v1652_v34  ;;  %3447 = vmatpush3.bf16.msra.mxu1 %v633_v56  ;;  %v1738_v56 = vunpack.c.l.bf16 %v4315_v44  ;;  %v4677_v44 = vsub.f32 %v4227_v57, %v4237_v0  ;;  %v4681_v57 = vsub.f32 %v4285_v41, %v4289_v47 }
 0x3a4   :  { %3458 = vmatprep.subr.bf16.mxu1 %v4671_v22 }
 0x3a5   :  { %3571 = vpow.bf16 %v1689_v31  ;;  %v1536_v0 = vmul.f32 1.442695, %v4681_v57 }
 0x3a6   :  { %1764 = vadd.xlane.f32.xlu0 %v1763_v16  ;;  %3449 = vmatmul.mubr.msk.bf16.vlgmr.msra.gmra.mxu1 %vm1433_vm4, %v4413_v6  ;;  %v1609_v23 = vpop.permute.xlu0 %1608  ;;  %v4673_v6 = vsub.f32 %v4266_v25, %v4277_v32 }
 0x3a7   :  { %v1638_v61 = vsub.f32 %v4190_v11, %v1609_v23  ;;  %3460 = vmatprep.mubr.msk.bf16.mxu1 %vm3786_vm2, %v4671_v22  ;;  %v1754_v23 = vsel %vm1433_vm4, %v1738_v56, 0.0 }
 0x3a8   :  { %v1530_v17 = vmul.f32 1.442695, %v4673_v6 }
 0x3a9   :  { %v1654_v3 = vpack.c.bf16 %v1638_v61, %v1638_v61  ;;  %v1740_v61 = vunpack.c.l.bf16 %v4387_v4  ;;  %v4679_v4 = vsub.f32 %v4244_v2, %v4249_v8  ;;  %v4682_v2 = vsub.f32 %v4297_v43, %v4301_v12  ;;  %v1710_v12 = vld [vmem:[#allocation4 + $0x20] sm:$0xff] }
 0x3aa   :  { %v641_v14 = vpop.permute.xlu0 %640 }
 0x3ab   :  { %v1695_v1 = vmul.bf16 1069105081, %v1654_v3  ;;  %3459 = vmatpush3.bf16.msra.mxu1 %v641_v14  ;;  %v1760_v14 = vsel %vm1433_vm4, %v1740_v61, 0.0 }
 0x3ac   :  { %3470 = vmatprep.subr.bf16.mxu1 %v4671_v22 }
 0x3ad   :  { %3573 = vpow.bf16 %v1695_v1  ;;  %v4678_v1 = vsub.f32 %v4246_v7, %v4257_v18  ;;  %v1540_v7 = vmul.f32 1.442695, %v4682_v2 }
 0x3ae   :  { %3575 = vpow2.f32 %v1524_v58  ;;  %3461 = vmatmul.mubr.msk.bf16.vlgmr.msra.gmra.mxu1 %vm1433_vm4, %v4423_v60  ;;  %v1619_v11 = vpop.permute.xlu0 %1618  ;;  %v1522_v58 = vmul.f32 1.442695, %v4677_v44 }
 0x3af   :  { %v1640_v28 = vsub.f32 %v4212_v30, %v1619_v11  ;;  %3472 = vmatprep.mubr.msk.bf16.mxu1 %vm3786_vm2, %v4671_v22  ;;  %3577 = vpow2.f32 %v1530_v17  ;;  %v4675_v30 = vsub.f32 %v4349_v38, %v4358_v52  ;;  %v1526_v6 = vmul.f32 1.442695, %v4678_v1 }
 0x3b0   :  { %v1528_v17 = vmul.f32 1.442695, %v4679_v4  ;;  %v4680_v11 = vsub.f32 %v4264_v21, %v4269_v27  ;;  %v4683_v21 = vsub.f32 %v4309_v29, %v4313_v37  ;;  %v1711_v37 = vld [vmem:[#allocation4 + $0x28] sm:$0xff] }
 0x3b1   :  { %v1656_v48 = vpack.c.bf16 %v1640_v28, %v1640_v28  ;;  %v1538_v32 = vmul.f32 1.442695, %v4675_v30 }
 0x3b2   :  { %v645_v59 = vpop.permute.xlu0 %644  ;;  %v1532_v28 = vmul.f32 1.442695, %v4680_v11  ;;  %v1544_v27 = vmul.f32 1.442695, %v4683_v21 }
 0x3b3   :  { %v3572_v26 = vpop.eup %3571  ;;  %v1701_v39 = vmul.bf16 1069105081, %v1656_v48  ;;  %3471 = vmatpush3.bf16.msra.mxu1 %v645_v59 }
 0x3b4   :  { %3482 = vmatprep.subr.bf16.mxu1 %v4671_v22  ;;  %v1748_v25 = vunpack.c.l.bf16 %v3572_v26 }
 0x3b5   :  { %3579 = vpow.bf16 %v1701_v39 }
 0x3b6   :  { %3581 = vpow2.f32 %v1534_v19  ;;  %3473 = vmatmul.mubr.msk.bf16.vlgmr.msra.gmra.mxu1 %vm1433_vm4, %v3572_v26  ;;  %v653_v60 = vpop.permute.xlu0 %652  ;;  %v1784_v24 = vsel %vm1433_vm4, %v1748_v25, 0.0 }
 0x3b7   :  { %1785 = vadd.xlane.f32.xlu1 %v1784_v24  ;;  %3483 = vmatpush3.bf16.msra.mxu1 %v653_v60  ;;  %3583 = vpow2.f32 %v1538_v32  ;;  %v1712_v24 = vld [vmem:[#allocation4 + $0x30] sm:$0xff] }
 0x3b8   :  { %3484 = vmatprep.mubr.msk.bf16.mxu1 %vm3786_vm2, %v4671_v22  ;;  %3494 = vmatprep.subr.bf16.mxu1 %v4671_v22  ;;  %3585 = vpow2.f32 %v1542_v53 }
 0x3b9   :  { %3587 = vpow2.f32 %v1522_v58 }
 0x3ba   :  { %v657_v63 = vpop.permute.xlu0 %656  ;;  %3589 = vpow2.f32 %v1526_v6  ;;  %v1715_v6 = vld [vmem:[#allocation4 + $0x48] sm:$0xff] }
 0x3bb   :  { %v3574_v51 = vpop.eup %3573  ;;  %3591 = vpow2.f32 %v1528_v17 }
 0x3bc   :  { %v4486_v38 = vpop.eup %3575  ;;  %v1750_v52 = vunpack.c.l.bf16 %v3574_v51  ;;  %3593 = vpow2.f32 %v1532_v28 }
 0x3bd   :  { %1878 = vperm.xlu0 %3534, %v4486_v38   ;;  %v4491_v33 = vpop.eup %3577  ;;  %3595 = vpow2.f32 %v1536_v0  ;;  %v1727_v32 = vmul.f32 %v4486_v38, %v1711_v37 }
 0x3be   :  { %3485 = vmatmul.mubr.msk.bf16.vlgmr.msra.gmra.mxu1 %vm1433_vm4, %v3574_v51  ;;  %v1790_v36 = vsel %vm1433_vm4, %v1750_v52, 0.0  ;;  %3597 = vpow2.f32 %v1540_v7  ;;  %v1717_v7 = vld [vmem:[#allocation4 + $0x58] sm:$0xff] }
 0x3bf   :  { %3495 = vmatpush3.bf16.msra.mxu1 %v657_v63  ;;  %1791 = vadd.xlane.f32.xlu1 %v1790_v36  ;;  %3599 = vpow2.f32 %v1544_v27  ;;  %v1713_v63 = vld [vmem:[#allocation4 + $0x38] sm:$0xff] }
 0x3c0   :  { %3496 = vmatprep.mubr.msk.bf16.mxu1 %vm3786_vm2, %v4671_v22 }
 0x3c1   :  { %1893 = vperm.xlu0 %3534, %v4491_v33  }
 0x3c3   :  { %v3580_v45 = vpop.eup %3579 }
 0x3c4   :  { %v4496_v35 = vpop.eup %3581  ;;  %v1752_v34 = vunpack.c.l.bf16 %v3580_v45 }
 0x3c5   :  { %1903 = vperm.xlu0 %3534, %v4496_v35   ;;  %v4499_v15 = vpop.f32.mrf.mxu1  ;;  %v4504_v31 = vpop.eup %3583 }
 0x3c6   :  { %3497 = vmatmul.mubr.msk.bf16.vlgmr.msra.gmra.mxu1 %vm1433_vm4, %v3580_v45  ;;  %v1796_v10 = vsel %vm1433_vm4, %v1752_v34, 0.0  ;;  %v4509_v3 = vpop.eup %3585 }
 0x3c7   :  { %v3414_v16 = vpop.f32.mrf.mxu1  ;;  %1797 = vadd.xlane.f32.xlu1 %v1796_v10  ;;  %v3588_v48 = vpop.eup %3587 }
 0x3c8   :  { %v3590_v18 = vpop.eup %3589  ;;  %v1726_v25 = vmul.f32 %v3588_v48, %v1710_v12 }
 0x3c9   :  { %1913 = vperm.xlu0 %3534, %v4504_v31   ;;  %v1987_v22 = vpop.f32.mrf.mxu1  ;;  %v3592_v47 = vpop.eup %3591  ;;  %v1728_v51 = vmul.f32 %v3590_v18, %v1712_v24 }
 0x3ca   :  { %v3594_v59 = vpop.eup %3593  ;;  %v1729_v16 = vmul.f32 %v3592_v47, %v1713_v63  ;;  %v1714_v22 = vld [vmem:[#allocation4 + $0x40] sm:$0xff] }
 0x3cb   :  { %v3415_v55 = vpop.f32.mrf.mxu1  ;;  %1755 = vadd.xlane.f32.xlu1 %v1754_v23  ;;  %v3596_v26 = vpop.eup %3595  ;;  %v1731_v28 = vmul.f32 %v3594_v59, %v1715_v6 }
 0x3cc   :  { %v4536_v39 = vpop.eup %3597 }
 0x3cd   :  { %1923 = vperm.xlu0 %3534, %v4509_v3   ;;  %v4539_v43 = vpop.eup %3599 }
 0x3cf   :  { %1761 = vadd.xlane.f32.xlu1 %v1760_v14  ;;  %v1730_v14 = vmul.f32 %v4491_v33, %v1714_v22  ;;  %v4684_v33 = vsub.f32 %v4159_v46, %v4164_v50 }
 0x3e0   :  { %v4528_v40 = vpop.f32.mrf.mxu0  ;;  %1873 = vperm.xlu1 %3533, %v3588_v48  }
 0x3e2   :  { %v3420_v8 = vpop.f32.mrf.mxu0 }
 0x3e3   :  { %v1516_v8 = vmul.f32 1.442695, %v4684_v33 }
 0x3e4   :  { %v2030_v19 = vpop.f32.mrf.mxu0  ;;  %1883 = vperm.xlu1 %3533, %v3590_v18  }
 0x3e5   :  { %v1733_v19 = vmul.f32 %v3596_v26, %v1717_v7 }
 0x3e6   :  { %v3421_v41 = vpop.f32.mrf.mxu0 }
 0x3e8   :  { %1888 = vperm.xlu1 %3533, %v3592_v47  }
 0x3ec   :  { %1898 = vperm.xlu1 %3533, %v3594_v59   ;;  %v4685_v59 = vsub.f32 %v4194_v13, %v4201_v20  ;;  %v1721_v13 = vld [vmem:[#allocation4 + $0x78] sm:$0xff] }
 0x3ee   :  { %v1520_v12 = vmul.f32 1.442695, %v4685_v59 }
 0x3f0   :  { %1908 = vperm.xlu1 %3533, %v3596_v26  }
 0x3f4   :  { %1918 = vperm.xlu1 %3533, %v4536_v39  }
 0x3f8   :  { %1928 = vperm.xlu1 %3533, %v4539_v43  }
 0x3fb   :  { %v1768_v29 = vpop.xlane.xlu0 %1767 }
 0x3fc   :  { %v1806_v30 = vadd.f32 %v1768_v29, %v1726_v25  ;;  %v1719_v29 = vld [vmem:[#allocation4 + $0x68] sm:$0xff] }
 0x3fd   :  { %v1735_v46 = vmul.f32 %v4536_v39, %v1719_v29 }
 0x3fe   :  { %1823 = vst.msk [vmem:[#allocation4 + $0x20] sm:$0xff] %vm277_vm5, %v1806_v30 }
 0x3ff   :  { %v1771_v60 = vpop.xlane.xlu1 %1770 }
 0x400   :  { %v1807_v62 = vadd.f32 %v1771_v60, %v1727_v32  ;;  %v1737_v60 = vmul.f32 %v4539_v43, %v1721_v13 }
 0x402   :  { %1824 = vst.msk [vmem:[#allocation4 + $0x28] sm:$0xff] %vm277_vm5, %v1807_v62  ;;  %v4545_v53 = vpop.f32.mrf.mxu1 }
 0x403   :  { %v1774_v52 = vpop.xlane.xlu0 %1773 }
 0x404   :  { %v1808_v36 = vadd.f32 %v1774_v52, %v1728_v51  ;;  %v3426_v45 = vpop.f32.mrf.mxu1  ;;  %v1707_v51 = vld [vmem:[#allocation4 + $0x8] sm:$0xff] }
 0x405   :  { %v2690_v34 = vld [vmem:[#allocation4 + $0x20] sm:$0xff] }
 0x406   :  { %1825 = vst.msk [vmem:[#allocation4 + $0x30] sm:$0xff] %vm277_vm5, %v1808_v36  ;;  %v2073_v10 = vpop.f32.mrf.mxu1  ;;  %v4548_v56 = vpop.f32.mrf.mxu0  ;;  %3601 = vrcp.f32 %v2690_v34  ;;  %v1709_v34 = vld [vmem:[#allocation4 + $0x18] sm:$0xff] }
 0x407   :  { %v1777_v38 = vpop.xlane.xlu0 %1776 }
 0x408   :  { %v1809_v23 = vadd.f32 %v1777_v38, %v1729_v16  ;;  %v3427_v61 = vpop.f32.mrf.mxu1  ;;  %v3432_v55 = vpop.f32.mrf.mxu0 }
 0x409   :  { %v2691_v44 = vld [vmem:[#allocation4 + $0x28] sm:$0xff] }
 0x40a   :  { %1826 = vst.msk [vmem:[#allocation4 + $0x38] sm:$0xff] %vm277_vm5, %v1809_v23  ;;  %v2116_v58 = vpop.f32.mrf.mxu0  ;;  %3603 = vrcp.f32 %v2691_v44 }
 0x40b   :  { %v1780_v1 = vpop.xlane.xlu1 %1779 }
 0x40c   :  { %v1810_v4 = vadd.f32 %v1780_v1, %v1730_v14  ;;  %v3433_v17 = vpop.f32.mrf.mxu0  ;;  %v1840_v1 = vld [vmem:[#allocation5 + $0x28] sm:$0xff] }
 0x40d   :  { %v2692_v11 = vld [vmem:[#allocation4 + $0x30] sm:$0xff] }
 0x40e   :  { %1827 = vst.msk [vmem:[#allocation4 + $0x40] sm:$0xff] %vm277_vm5, %v1810_v4  ;;  %3605 = vrcp.f32 %v2692_v11 }
 0x40f   :  { %v1783_v57 = vpop.xlane.xlu0 %1782 }
 0x410   :  { %v1811_v0 = vadd.f32 %v1783_v57, %v1731_v28 }
 0x411   :  { %v2693_v48 = vld [vmem:[#allocation4 + $0x38] sm:$0xff] }
 0x412   :  { %3607 = vrcp.f32 %v2693_v48  ;;  %1828 = vst.msk [vmem:[#allocation4 + $0x48] sm:$0xff] %vm277_vm5, %v1811_v0 }
 0x413   :  { %v3602_v2 = vpop.eup %3601 }
 0x414   :  { %2756 = vperm.xlu0 %3534, %v3602_v2   ;;  %v1716_v2 = vld [vmem:[#allocation4 + $0x50] sm:$0xff] }
 0x415   :  { %v2694_v18 = vld [vmem:[#allocation4 + $0x40] sm:$0xff] }
 0x416   :  { %3609 = vrcp.f32 %v2694_v18 }
 0x417   :  { %v3604_v21 = vpop.eup %3603  ;;  %v1789_v27 = vpop.xlane.xlu0 %1788  ;;  %3611 = vpow2.f32 %v1516_v8  ;;  %v4686_v8 = vsub.f32 %v4161_v49, %v4171_v42  ;;  %v1718_v49 = vld [vmem:[#allocation4 + $0x60] sm:$0xff] }
 0x418   :  { %v1813_v41 = vadd.f32 %v1789_v27, %v1733_v19  ;;  %2761 = vperm.xlu1 %3533, %v3604_v21   ;;  %v1732_v27 = vmul.f32 %v4496_v35, %v1716_v2  ;;  %v1734_v35 = vmul.f32 %v4504_v31, %v1718_v49 }
 0x419   :  { %v2695_v47 = vld [vmem:[#allocation4 + $0x48] sm:$0xff]  ;;  %v1514_v18 = vmul.f32 1.442695, %v4686_v8  ;;  %v1842_v8 = vld [vmem:[#allocation5 + $0x38] sm:$0xff] }
 0x41a   :  { %3613 = vrcp.f32 %v2695_v47  ;;  %1830 = vst.msk [vmem:[#allocation4 + $0x58] sm:$0xff] %vm277_vm5, %v1813_v41 }
 0x41b   :  { %v3606_v25 = vpop.eup %3605  ;;  %3615 = vpow2.f32 %v1520_v12  ;;  %v4687_v12 = vsub.f32 %v4183_v5, %v4186_v9  ;;  %v1720_v9 = vld [vmem:[#allocation4 + $0x70] sm:$0xff] }
 0x41c   :  { %2766 = vperm.xlu0 %3534, %v3606_v25  }
 0x41d   :  { %v1518_v25 = vmul.f32 1.442695, %v4687_v12 }
 0x41f   :  { %v3608_v50 = vpop.eup %3607  ;;  %v1795_v26 = vpop.xlane.xlu0 %1794 }
 0x420   :  { %v1815_v37 = vadd.f32 %v1795_v26, %v1735_v46  ;;  %2771 = vperm.xlu1 %3533, %v3608_v50  }
 0x421   :  { %v2697_v30 = vld [vmem:[#allocation4 + $0x58] sm:$0xff] }
 0x422   :  { %3617 = vrcp.f32 %v2697_v30  ;;  %1832 = vst.msk [vmem:[#allocation4 + $0x68] sm:$0xff] %vm277_vm5, %v1815_v37 }
 0x423   :  { %v3610_v32 = vpop.eup %3609 }
 0x424   :  { %2776 = vperm.xlu0 %3534, %v3610_v32   ;;  %v3612_v20 = vpop.eup %3611 }
 0x425   :  { %v1723_v63 = vmul.f32 %v3612_v20, %v1707_v51  ;;  %v1706_v51 = vld [vmem:[#allocation4] sm:$0xff] }
 0x427   :  { %v3614_v24 = vpop.eup %3613  ;;  %v1801_v62 = vpop.xlane.xlu0 %1800 }
 0x428   :  { %v1817_v52 = vadd.f32 %v1801_v62, %v1737_v60  ;;  %2781 = vperm.xlu1 %3533, %v3614_v24   ;;  %v3616_v36 = vpop.eup %3615  ;;  %v1736_v24 = vmul.f32 %v4509_v3, %v1720_v9 }
 0x429   :  { %v2699_v39 = vld [vmem:[#allocation4 + $0x68] sm:$0xff]  ;;  %v1725_v16 = vmul.f32 %v3616_v36, %v1709_v34 }
 0x42a   :  { %3619 = vrcp.f32 %v2699_v39  ;;  %1834 = vst.msk [vmem:[#allocation4 + $0x78] sm:$0xff] %vm277_vm5, %v1817_v52 }
 0x42b   :  { %v1759_v45 = vpop.xlane.xlu0 %1758 }
 0x42c   :  { %v1803_v10 = vadd.f32 %v1759_v45, %v1723_v63 }
 0x42e   :  { %1820 = vst.msk [vmem:[#allocation4 + $0x8] sm:$0xff] %vm277_vm5, %v1803_v10 }
 0x42f   :  { %v3618_v38 = vpop.eup %3617  ;;  %v4566_v22 = vpop.f32.mrf.mxu1 }
 0x430   :  { %v1765_v43 = vpop.xlane.xlu0 %1764  ;;  %2791 = vperm.xlu1 %3533, %v3618_v38  }
 0x431   :  { %v1805_v23 = vadd.f32 %v1765_v43, %v1725_v16  ;;  %v2701_v61 = vld [vmem:[#allocation4 + $0x78] sm:$0xff]  ;;  %v3438_v55 = vpop.f32.mrf.mxu1  ;;  %v1708_v16 = vld [vmem:[#allocation4 + $0x10] sm:$0xff] }
 0x432   :  { %3621 = vrcp.f32 %v2701_v61 }
 0x433   :  { %1822 = vst.msk [vmem:[#allocation4 + $0x18] sm:$0xff] %vm277_vm5, %v1805_v23  ;;  %v2159_v44 = vpop.f32.mrf.mxu1 }
 0x435   :  { %v3439_v58 = vpop.f32.mrf.mxu1  ;;  %v2199_v14 = vpop.f32.mrf.mxu0  ;;  %v2687_v0 = vld [vmem:[#allocation4 + $0x8] sm:$0xff] }
 0x436   :  { %3623 = vrcp.f32 %v2687_v0 }
 0x437   :  { %v3620_v6 = vpop.eup %3619  ;;  %v3444_v4 = vpop.f32.mrf.mxu0 }
 0x438   :  { %v1879_v17 = vpop.permute.xlu0 %1878  ;;  %2801 = vperm.xlu1 %3533, %v3620_v6  }
 0x439   :  { %v1936_v11 = vmul.f32 %v1879_v17, %v1840_v1  ;;  %v2202_v28 = vpop.f32.mrf.mxu0 }
 0x43a   :  { %v2689_v19 = vld [vmem:[#allocation4 + $0x18] sm:$0xff] }
 0x43b   :  { %v2640_v57 = vadd.f32 %v2199_v14, %v1936_v11  ;;  %v3445_v48 = vpop.f32.mrf.mxu0  ;;  %3625 = vrcp.f32 %v2689_v19  ;;  %v1839_v14 = vld [vmem:[#allocation5 + $0x20] sm:$0xff] }
 0x43c   :  { %3627 = vpow2.f32 %v1514_v18 }
 0x43d   :  { %2656 = vst.msk [vmem:[#allocation5 + $0x28] sm:$0xff] %vm310_vm1, %v2640_v57  ;;  %v4570_v7 = vpop.f32.mrf.mxu0  ;;  %3629 = vpow2.f32 %v1518_v25 }
 0x43f   :  { %v3622_v33 = vpop.eup %3621  ;;  %v3456_v21 = vpop.f32.mrf.mxu0 }
 0x440   :  { %v1786_v41 = vpop.xlane.xlu1 %1785  ;;  %2811 = vperm.xlu1 %3533, %v3622_v33   ;;  %v1841_v33 = vld [vmem:[#allocation5 + $0x30] sm:$0xff] }
 0x441   :  { %v1812_v47 = vadd.f32 %v1786_v41, %v1732_v27  ;;  %v2288_v59 = vpop.f32.mrf.mxu0 }
 0x442   :  { %v1844_v59 = vld [vmem:[#allocation5 + $0x48] sm:$0xff] }
 0x443   :  { %1829 = vst.msk [vmem:[#allocation4 + $0x50] sm:$0xff] %vm277_vm5, %v1812_v47  ;;  %v3457_v29 = vpop.f32.mrf.mxu0  ;;  %v3624_v32 = vpop.eup %3623 }
 0x444   :  { %1858 = vperm.xlu1 %3533, %v3612_v20  }
 0x445   :  { %v4580_v42 = vpop.f32.mrf.mxu0 }
 0x447   :  { %v3468_v46 = vpop.f32.mrf.mxu0 }
 0x448   :  { %v1792_v50 = vpop.xlane.xlu1 %1791  ;;  %1868 = vperm.xlu1 %3533, %v3616_v36   ;;  %v3626_v20 = vpop.eup %3625 }
 0x449   :  { %v1814_v26 = vadd.f32 %v1792_v50, %v1734_v35  ;;  %v2374_v37 = vpop.f32.mrf.mxu0  ;;  %v4587_v62 = vpop.eup %3627  ;;  %v1843_v50 = vld [vmem:[#allocation5 + $0x40] sm:$0xff] }
 0x44a   :  { %v2696_v30 = vld [vmem:[#allocation4 + $0x50] sm:$0xff]  ;;  %v1722_v45 = vmul.f32 %v4587_v62, %v1706_v51  ;;  %v4591_v34 = vpop.eup %3629 }
 0x44b   :  { %1831 = vst.msk [vmem:[#allocation4 + $0x60] sm:$0xff] %vm277_vm5, %v1814_v26  ;;  %v3469_v5 = vpop.f32.mrf.mxu0  ;;  %3631 = vrcp.f32 %v2696_v30  ;;  %v1724_v23 = vmul.f32 %v4591_v34, %v1708_v16  ;;  %v1894_v26 = vpop.permute.xlu0 %1893  ;;  %v1846_v30 = vld [vmem:[#allocation5 + $0x58] sm:$0xff] }
 0x44c   :  { %2741 = vperm.xlu1 %3533, %v3624_v32   ;;  %v1939_v9 = vmul.f32 %v1894_v26, %v1843_v50 }
 0x44d   :  { %v4584_v13 = vpop.f32.mrf.mxu0 }
 0x44f   :  { %v3480_v60 = vpop.f32.mrf.mxu0 }
 0x450   :  { %v1798_v31 = vpop.xlane.xlu1 %1797  ;;  %2751 = vperm.xlu1 %3533, %v3626_v20  }
 0x451   :  { %v1816_v52 = vadd.f32 %v1798_v31, %v1736_v24  ;;  %v2460_v39 = vpop.f32.mrf.mxu0  ;;  %v1848_v24 = vld [vmem:[#allocation5 + $0x68] sm:$0xff] }
 0x452   :  { %v2698_v63 = vld [vmem:[#allocation4 + $0x60] sm:$0xff] }
 0x453   :  { %1833 = vst.msk [vmem:[#allocation4 + $0x70] sm:$0xff] %vm277_vm5, %v1816_v52  ;;  %v3481_v36 = vpop.f32.mrf.mxu0  ;;  %3633 = vrcp.f32 %v2698_v63  ;;  %v1845_v63 = vld [vmem:[#allocation5 + $0x50] sm:$0xff] }
 0x454   :  { %v1756_v10 = vpop.xlane.xlu1 %1755  ;;  %v1904_v36 = vpop.permute.xlu0 %1903 }
 0x455   :  { %v1802_v38 = vadd.f32 %v1756_v10, %v1722_v45  ;;  %v4593_v3 = vpop.f32.mrf.mxu0  ;;  %v1850_v10 = vld [vmem:[#allocation5 + $0x78] sm:$0xff] }
 0x457   :  { %1819 = vst.msk [vmem:[#allocation4] sm:$0xff] %vm277_vm5, %v1802_v38  ;;  %v3492_v43 = vpop.f32.mrf.mxu0 }
 0x458   :  { %v3632_v61 = vpop.eup %3631  ;;  %v1762_v55 = vpop.xlane.xlu1 %1761 }
 0x459   :  { %v1804_v44 = vadd.f32 %v1762_v55, %v1724_v23  ;;  %v2546_v58 = vpop.f32.mrf.mxu0  ;;  %2786 = vperm.xlu0 %3534, %v3632_v61  }
 0x45a   :  { %v2700_v1 = vld [vmem:[#allocation4 + $0x70] sm:$0xff] }
 0x45b   :  { %1821 = vst.msk [vmem:[#allocation4 + $0x10] sm:$0xff] %vm277_vm5, %v1804_v44  ;;  %v3493_v6 = vpop.f32.mrf.mxu0  ;;  %3635 = vrcp.f32 %v2700_v1 }
 0x45c   :  { %v1874_v4 = vpop.permute.xlu1 %1873 }
 0x45d   :  { %v1935_v17 = vmul.f32 %v1874_v4, %v1839_v14  ;;  %v4598_v11 = vpop.f32.mrf.mxu0  ;;  %v1914_v14 = vpop.permute.xlu0 %1913 }
 0x45e   :  { %v2686_v19 = vld [vmem:[#allocation4] sm:$0xff] }
 0x45f   :  { %v2639_v28 = vadd.f32 %v4566_v22, %v1935_v17  ;;  %v3504_v57 = vpop.f32.mrf.mxu0  ;;  %3637 = vrcp.f32 %v2686_v19 }
 0x460   :  { %v3634_v0 = vpop.eup %3633  ;;  %v1884_v48 = vpop.permute.xlu1 %1883 }
 0x461   :  { %2655 = vst.msk [vmem:[#allocation5 + $0x20] sm:$0xff] %vm310_vm1, %v2639_v28  ;;  %v2632_v2 = vpop.f32.mrf.mxu0  ;;  %2796 = vperm.xlu0 %3534, %v3634_v0   ;;  %v1937_v27 = vmul.f32 %v1884_v48, %v1841_v33  ;;  %v1849_v0 = vld [vmem:[#allocation5 + $0x70] sm:$0xff] }
 0x462   :  { %v2688_v29 = vld [vmem:[#allocation4 + $0x10] sm:$0xff] }
 0x463   :  { %v3505_v18 = vpop.f32.mrf.mxu0  ;;  %3639 = vrcp.f32 %v2688_v29 }
 0x464   :  { %v1889_v21 = vpop.permute.xlu1 %1888 }
 0x465   :  { %v1938_v41 = vmul.f32 %v1889_v21, %v1842_v8 }
 0x466   :  { %v2242_v47 = vpop.f32.mrf.mxu1 }
 0x467   :  { %v2642_v12 = vadd.f32 %v4570_v7, %v1938_v41  ;;  %v2641_v22 = vadd.f32 %v2242_v47, %v1937_v27 }
 0x468   :  { %v3636_v25 = vpop.eup %3635  ;;  %v3450_v49 = vpop.f32.mrf.mxu1  ;;  %v2722_v47 = vld [vmem:[#allocation5 + $0x20] sm:$0xff] }
 0x469   :  { %v1899_v46 = vpop.permute.xlu1 %1898  ;;  %2658 = vst.msk [vmem:[#allocation5 + $0x38] sm:$0xff] %vm310_vm1, %v2642_v12  ;;  %2657 = vst.msk [vmem:[#allocation5 + $0x30] sm:$0xff] %vm310_vm1, %v2641_v22  ;;  %2806 = vperm.xlu0 %3534, %v3636_v25   ;;  %v2723_v12 = vld [vmem:[#allocation5 + $0x28] sm:$0xff] }
 0x46a   :  { %v1940_v35 = vmul.f32 %v1899_v46, %v1844_v59  ;;  %v2245_v37 = vpop.f32.mrf.mxu1 }
 0x46c   :  { %v2644_v32 = vadd.f32 %v4580_v42, %v1940_v35  ;;  %v3451_v5 = vpop.f32.mrf.mxu1  ;;  %v3638_v16 = vpop.eup %3637 }
 0x46d   :  { %v1909_v7 = vpop.permute.xlu1 %1908  ;;  %1853 = vperm.xlu0 %3534, %v4587_v62  }
 0x46e   :  { %2660 = vst.msk [vmem:[#allocation5 + $0x48] sm:$0xff] %vm310_vm1, %v2644_v32  ;;  %v1942_v20 = vmul.f32 %v1909_v7, %v1846_v30  ;;  %v2328_v60 = vpop.f32.mrf.mxu1 }
 0x46f   :  { %v2643_v51 = vadd.f32 %v2328_v60, %v1939_v9 }
 0x470   :  { %v2646_v31 = vadd.f32 %v4584_v13, %v1942_v20  ;;  %v3462_v52 = vpop.f32.mrf.mxu1  ;;  %v1941_v13 = vmul.f32 %v1904_v36, %v1845_v63  ;;  %v3640_v58 = vpop.eup %3639  ;;  %v2724_v46 = vld [vmem:[#allocation5 + $0x30] sm:$0xff]  ;;  %v2725_v35 = vld [vmem:[#allocation5 + $0x38] sm:$0xff] }
 0x471   :  { %v1919_v39 = vpop.permute.xlu1 %1918  ;;  %2659 = vst.msk [vmem:[#allocation5 + $0x40] sm:$0xff] %vm310_vm1, %v2643_v51  ;;  %1863 = vperm.xlu0 %3534, %v4591_v34   ;;  %v1838_v36 = vld [vmem:[#allocation5 + $0x18] sm:$0xff] }
 0x472   :  { %2662 = vst.msk [vmem:[#allocation5 + $0x58] sm:$0xff] %vm310_vm1, %v2646_v31  ;;  %v1944_v42 = vmul.f32 %v1919_v39, %v1848_v24  ;;  %v2331_v45 = vpop.f32.mrf.mxu1  ;;  %v1836_v39 = vld [vmem:[#allocation5 + $0x8] sm:$0xff] }
 0x474   :  { %v2648_v62 = vadd.f32 %v4593_v3, %v1944_v42  ;;  %v3463_v38 = vpop.f32.mrf.mxu1  ;;  %v1847_v3 = vld [vmem:[#allocation5 + $0x60] sm:$0xff] }
 0x475   :  { %v1929_v43 = vpop.permute.xlu1 %1928  ;;  %2736 = vperm.xlu0 %3534, %v3638_v16   ;;  %v1943_v4 = vmul.f32 %v1914_v14, %v1847_v3  ;;  %v2727_v7 = vld [vmem:[#allocation5 + $0x48] sm:$0xff] }
 0x476   :  { %2664 = vst.msk [vmem:[#allocation5 + $0x68] sm:$0xff] %vm310_vm1, %v2648_v62  ;;  %v1946_v23 = vmul.f32 %v1929_v43, %v1850_v10  ;;  %v2414_v61 = vpop.f32.mrf.mxu1 }
 0x477   :  { %v2645_v44 = vadd.f32 %v2414_v61, %v1941_v13 }
 0x478   :  { %v2650_v55 = vadd.f32 %v4598_v11, %v1946_v23  ;;  %v3474_v34 = vpop.f32.mrf.mxu1  ;;  %v1924_v11 = vpop.permute.xlu0 %1923  ;;  %v2726_v5 = vld [vmem:[#allocation5 + $0x40] sm:$0xff]  ;;  %v3543_v23 = vld [vmem:[#allocation14 + $0x38] sm:$0xff]  }
 0x479   :  { %2661 = vst.msk [vmem:[#allocation5 + $0x50] sm:$0xff] %vm310_vm1, %v2645_v44  ;;  %2746 = vperm.xlu0 %3534, %v3640_v58   ;;  %v1945_v33 = vmul.f32 %v1924_v11, %v1849_v0  ;;  %v2729_v38 = vld [vmem:[#allocation5 + $0x58] sm:$0xff]  ;;  %v3544_v44 = vld [vmem:[#allocation14 + $0x30] sm:$0xff]   ;;  %3506 = vmatprep.subr.bf16.mxu1 %v3543_v23  ;;  %v1835_v0 = vld [vmem:[#allocation5] sm:$0xff] }
 0x47a   :  { %2666 = vst.msk [vmem:[#allocation5 + $0x78] sm:$0xff] %vm310_vm1, %v2650_v55  ;;  %v2417_v1 = vpop.f32.mrf.mxu1  ;;  %3507 = vmatpush3.bf16.msra.mxu1 %v3543_v23 }
 0x47b   :  { %3508 = vmatprep.subr.bf16.mxu1 %v3544_v44 }
 0x47c   :  { %v3475_v6 = vpop.f32.mrf.mxu1 }
 0x47e   :  { %v2500_v17 = vpop.f32.mrf.mxu1  ;;  %3509 = vmatpush3.bf16.msra.mxu1 %v3544_v44 }
 0x47f   :  { %v2647_v28 = vadd.f32 %v2500_v17, %v1943_v4 }
 0x480   :  { %v3486_v57 = vpop.f32.mrf.mxu1  ;;  %v2728_v43 = vld [vmem:[#allocation5 + $0x50] sm:$0xff] }
 0x481   :  { %2663 = vst.msk [vmem:[#allocation5 + $0x60] sm:$0xff] %vm310_vm1, %v2647_v28  ;;  %v2733_v6 = vld [vmem:[#allocation5 + $0x78] sm:$0xff] }
 0x482   :  { %v2503_v48 = vpop.f32.mrf.mxu1 }
 0x484   :  { %v3487_v2 = vpop.f32.mrf.mxu1 }
 0x486   :  { %v2586_v8 = vpop.f32.mrf.mxu1 }
 0x487   :  { %v2649_v18 = vadd.f32 %v2586_v8, %v1945_v33  ;;  %v1837_v33 = vld [vmem:[#allocation5 + $0x10] sm:$0xff] }
 0x488   :  { %v3498_v19 = vpop.f32.mrf.mxu1  ;;  %v2730_v34 = vld [vmem:[#allocation5 + $0x60] sm:$0xff] }
 0x489   :  { %2665 = vst.msk [vmem:[#allocation5 + $0x70] sm:$0xff] %vm310_vm1, %v2649_v18 }
 0x48a   :  { %v2589_v21 = vpop.f32.mrf.mxu1 }
 0x48c   :  { %v3499_v27 = vpop.f32.mrf.mxu1 }
 0x48f   :  { %v2757_v41 = vpop.permute.xlu0 %2756 }
 0x490   :  { %v2818_v22 = vmul.f32 %v2757_v41, %v2722_v47  ;;  %v2732_v4 = vld [vmem:[#allocation5 + $0x70] sm:$0xff] }
 0x493   :  { %v2762_v59 = vpop.permute.xlu1 %2761 }
 0x494   :  { %v2819_v25 = vmul.f32 %v2762_v59, %v2723_v12 }
 0x496   :  { %v3183_v29 = vpack.c.bf16 %v2819_v25, %v2818_v22 }
 0x497   :  { %v2767_v49 = vpop.permute.xlu0 %2766 }
 0x498   :  { %2866 = vrot.lane.b32.xlu0 %v3183_v29, %s3792_s24  ;;  %v2820_v26 = vmul.f32 %v2767_v49, %v2724_v46 }
 0x49b   :  { %v2772_v50 = vpop.permute.xlu1 %2771 }
 0x49c   :  { %v2821_v37 = vmul.f32 %v2772_v50, %v2725_v35 }
 0x49e   :  { %v3184_v30 = vpack.c.bf16 %v2821_v37, %v2820_v26 }
 0x49f   :  { %v2777_v32 = vpop.permute.xlu0 %2776 }
 0x4a0   :  { %2868 = vrot.lane.b32.xlu1 %v3184_v30, %s3792_s24  ;;  %v2822_v20 = vmul.f32 %v2777_v32, %v2726_v5 }
 0x4a3   :  { %v2782_v9 = vpop.permute.xlu1 %2781 }
 0x4a4   :  { %v2823_v60 = vmul.f32 %v2782_v9, %v2727_v7 }
 0x4a6   :  { %v3185_v24 = vpack.c.bf16 %v2823_v60, %v2822_v20 }
 0x4a8   :  { %2880 = vrot.lane.b32.xlu0 %v3185_v24, %s3793_s25 }
 0x4ab   :  { %v2792_v31 = vpop.permute.xlu1 %2791 }
 0x4ac   :  { %v2825_v61 = vmul.f32 %v2792_v31, %v2729_v38 }
 0x4b3   :  { %v2802_v51 = vpop.permute.xlu1 %2801 }
 0x4bb   :  { %v2812_v52 = vpop.permute.xlu1 %2811 }
 0x4bc   :  { %v2829_v28 = vmul.f32 %v2812_v52, %v2733_v6  ;;  %v2920_v52 = vsub.s32 3, %v3910_v54 }
 0x4bf   :  { %v1859_v42 = vpop.permute.xlu1 %1858 }
 0x4c0   :  { %v1932_v63 = vmul.f32 %v1859_v42, %v1836_v39  ;;  %v3190_v39 = vld [vmem:[#allocation6] sm:$0xff]  }
 0x4c1   :  { %v4639_v42 = vld [vmem:[%s4667_s5] sm:$0xff]  ;;  %s3795_s5 = smov [#allocation15]  }
 0x4c2   :  { %v2636_v45 = vadd.f32 %v4528_v40, %v1932_v63  ;;  %v2731_v40 = vld [vmem:[#allocation5 + $0x68] sm:$0xff]  ;;  %v2921_v63 = vrot.slane %v4639_v42, %v2920_v52  ;;  %s3077_s29 = sshll.u32 %s3795_s5, 4  ;;  %s3078_s29 = int_to_ptr.vmem [resolvable:$true] %s3077_s29 }
 0x4c3   :  { %v1869_v10 = vpop.permute.xlu1 %1868  ;;  %v2827_v14 = vmul.f32 %v2802_v51, %v2731_v40  ;;  %s3750_s30 = scalar_lea.vmem %s3078_s29, 512  ;;  %p3755_p12 = scmp.lt.s32.totalorder %s3078_s29, %s3078_s29 }
 0x4c4   :  { %2652 = vst.msk [vmem:[#allocation5 + $0x8] sm:$0xff] %vm310_vm1, %v2636_v45  ;;  %v1934_v62 = vmul.f32 %v1869_v10, %v1838_v36  ;;  %v3197_v45 = vld [vmem:[#allocation6 + $0x8] sm:$0xff]   ;;  %v3191_v10 = vunpack.c.l.bf16 %v3190_v39  ;;  %p3751_p11 = scmp.ne.s32.totalorder %s3078_s29, %s3750_s30  ;;  %p3756_p13 = scmp.lt.s32.totalorder %s3750_s30, %s3750_s30 }
 0x4c5   :  { %v3195_v38 = vunpack.c.l.bf16 %v3197_v45 }
 0x4c6   :  { %v2638_v16 = vadd.f32 %v4548_v56, %v1934_v62  ;;  %p3757_p0 = por %p3756_p13, %p3755_p12 }
 0x4c7   :  { %v2742_v47 = vpop.permute.xlu1 %2741 }
 0x4c8   :  { %2654 = vst.msk [vmem:[#allocation5 + $0x18] sm:$0xff] %vm310_vm1, %v2638_v16  ;;  %p3758_p1 = pnand %p3757_p0, %p3751_p11 }
 0x4cb   :  { %v2719_v12 = vld [vmem:[#allocation5 + $0x8] sm:$0xff]  ;;  %v2752_v49 = vpop.permute.xlu1 %2751 }
 0x4cc   :  { %v2815_v29 = vmul.f32 %v2742_v47, %v2719_v12 }
 0x4cf   :  { %v2721_v26 = vld [vmem:[#allocation5 + $0x18] sm:$0xff] }
 0x4d0   :  { %v2817_v7 = vmul.f32 %v2752_v49, %v2721_v26 }
 0x4d4   :  { %v2787_v13 = vpop.permute.xlu0 %2786 }
 0x4d5   :  { %v2824_v55 = vmul.f32 %v2787_v13, %v2728_v43 }
 0x4d7   :  { %v3186_v58 = vpack.c.bf16 %v2825_v61, %v2824_v55  ;;  %v3192_v61 = vunpack.c.h.bf16 %v3190_v39  ;;  %v3196_v55 = vunpack.c.h.bf16 %v3197_v45 }
 0x4d9   :  { %2882 = vrot.lane.b32.xlu1 %v3186_v58, %s3793_s25 }
 0x4dc   :  { %v2797_v3 = vpop.permute.xlu0 %2796 }
 0x4dd   :  { %v2826_v56 = vmul.f32 %v2797_v3, %v2730_v34 }
 0x4df   :  { %v3187_v1 = vpack.c.bf16 %v2827_v14, %v2826_v56 }
 0x4e1   :  { %2894 = vrot.lane.b32.xlu0 %v3187_v1, %s3794_s26 }
 0x4e4   :  { %v2807_v17 = vpop.permute.xlu0 %2806 }
 0x4e5   :  { %v2828_v57 = vmul.f32 %v2807_v17, %v2732_v4 }
 0x4e7   :  { %v3188_v11 = vpack.c.bf16 %v2829_v28, %v2828_v57 }
 0x4e8   :  { %v1854_v48 = vpop.permute.xlu0 %1853 }
 0x4e9   :  { %v1931_v2 = vmul.f32 %v1854_v48, %v1835_v0  ;;  %2896 = vrot.lane.b32.xlu1 %v3188_v11, %s3794_s26 }
 0x4eb   :  { %v2635_v8 = vadd.f32 %v4499_v15, %v1931_v2 }
 0x4ec   :  { %v1864_v18 = vpop.permute.xlu0 %1863 }
 0x4ed   :  { %2651 = vst.msk [vmem:[#allocation5] sm:$0xff] %vm310_vm1, %v2635_v8  ;;  %v1933_v19 = vmul.f32 %v1864_v18, %v1837_v33 }
 0x4ef   :  { %v2637_v21 = vadd.f32 %v4545_v53, %v1933_v19 }
 0x4f0   :  { %v2737_v27 = vpop.permute.xlu0 %2736 }
 0x4f1   :  { %2653 = vst.msk [vmem:[#allocation5 + $0x10] sm:$0xff] %vm310_vm1, %v2637_v21 }
 0x4f4   :  { %v2747_v41 = vpop.permute.xlu0 %2746  ;;  %v2718_v59 = vld [vmem:[#allocation5] sm:$0xff] }
 0x4f5   :  { %v2814_v25 = vmul.f32 %v2737_v27, %v2718_v59 }
 0x4f7   :  { %v3181_v35 = vpack.c.bf16 %v2815_v29, %v2814_v25 }
 0x4f8   :  { %v2720_v15 = vld [vmem:[#allocation5 + $0x10] sm:$0xff] }
 0x4f9   :  { %v2816_v32 = vmul.f32 %v2747_v41, %v2720_v15 }
 0x4fb   :  { %v3182_v20 = vpack.c.bf16 %v2817_v7, %v2816_v32 }
 0x50a   :  { %v2867_v22 = vpop.permute.xlu0 %2866 }
 0x50b   :  { %v2900_v50 = vsel %vm310_vm1, %v3181_v35, %v2867_v22 }
 0x512   :  { %v2869_v37 = vpop.permute.xlu1 %2868 }
 0x513   :  { %v2903_v60 = vsel %vm310_vm1, %v3182_v20, %v2869_v37  ;;  %v3062_v20 = vsub.s32 5, %v3910_v54 }
 0x51a   :  { %v2881_v46 = vpop.permute.xlu0 %2880 }
 0x51b   :  { %v2905_v53 = vsel %vm1433_vm4, %v2900_v50, %v2881_v46 }
 0x54b   :  { %v2883_v9 = vpop.permute.xlu1 %2882 }
 0x54c   :  { %v2907_v24 = vsel %vm1433_vm4, %v2903_v60, %v2883_v9  ;;  %v3054_v9 = vsub.s32 4, %v3910_v54 }
 0x54e   :  { %v3055_v60 = vrot.slane %v4639_v42, %v3054_v9 }
 0x553   :  { %v2895_v30 = vpop.permute.xlu0 %2894 }
 0x554   :  { %v2910_v5 = vsel %vm2908_vm6, %v2905_v53, %v2895_v30 }
 0x555   :  { %3510 = vmatprep.mubr.msk.bf16.mxu1 %vm140_vm0, %v2910_v5 }
 0x55b   :  { %v2897_v31 = vpop.permute.xlu1 %2896 }
 0x55c   :  { %v2912_v51 = vsel %vm2908_vm6, %v2907_v24, %v2897_v31  ;;  %v3063_v31 = vrot.slane %v4639_v42, %v3062_v20 }
 0x55d   :  { %3511 = vmatmul.mubr.msk.bf16.vlgmr.msra.gmra.mxu1 %vm140_vm0, %v2912_v51 }
 0x61d   :  { %v3512_v36 = vpop.f32.mrf.mxu1 }
 0x61e   :  { %v2981_v16 = vadd.f32 %v3512_v36, %v2921_v63 }
 0x61f   :  { %v2972_v62 = vpop.f32.mrf.mxu1 }
 0x620   :  { %v2973_v43 = vadd.f32 %v2972_v62, %v2921_v63  ;;  %v2997_v58 = vadd.f32 %v3195_v38, %v2981_v16 }
 0x621   :  { %v3513_v13 = vpop.f32.mrf.mxu1 }
 0x622   :  { %v2995_v23 = vadd.f32 %v3191_v10, %v2973_v43  ;;  %v2984_v40 = vadd.f32 %v3513_v13, %v2921_v63  ;;  %v3005_v6 = vsel %vm140_vm0, %v2997_v58, 0.0 }
 0x623   :  { %v2975_v44 = vpop.f32.mrf.mxu1 }
 0x624   :  { %v2976_v34 = vadd.f32 %v2975_v44, %v2921_v63  ;;  %v2999_v3 = vsel %vm140_vm0, %v2995_v23, 0.0  ;;  %v2998_v56 = vadd.f32 %v3196_v55, %v2984_v40 }
 0x625   :  { %3000 = vadd.xlane.f32.xlu0 %v2999_v3 }
 0x626   :  { %v2996_v14 = vadd.f32 %v3192_v61, %v2976_v34  ;;  %v3008_v4 = vsel %vm140_vm0, %v2998_v56, 0.0 }
 0x628   :  { %v3002_v1 = vsel %vm140_vm0, %v2996_v14, 0.0 }
 0x629   :  { %3003 = vadd.xlane.f32.xlu1 %v3002_v1  ;;  %3006 = vadd.xlane.f32.xlu0 %v3005_v6 }
 0x62d   :  { %3009 = vadd.xlane.f32.xlu0 %v3008_v4 }
 0x6ae   :  { %v3001_v17 = vpop.xlane.xlu0 %3000 }
 0x6af   :  { %v3012_v28 = vmul.f32 0.03125, %v3001_v17 }
 0x6b1   :  { %v3016_v57 = vsub.f32 %v2995_v23, %v3012_v28 }
 0x6b2   :  { %v3004_v0 = vpop.xlane.xlu1 %3003  ;;  %v3007_v11 = vpop.xlane.xlu0 %3006 }
 0x6b3   :  { %v3013_v48 = vmul.f32 0.03125, %v3004_v0  ;;  %v3014_v2 = vmul.f32 0.03125, %v3007_v11  ;;  %v3020_v33 = vmul.f32 %v3016_v57, %v3016_v57 }
 0x6b5   :  { %v3017_v8 = vsub.f32 %v2996_v14, %v3013_v48  ;;  %v3018_v18 = vsub.f32 %v2997_v58, %v3014_v2  ;;  %v3024_v19 = vsel %vm140_vm0, %v3020_v33, 0.0 }
 0x6b6   :  { %3025 = vadd.xlane.f32.xlu1 %v3024_v19  ;;  %v3010_v21 = vpop.xlane.xlu0 %3009 }
 0x6b7   :  { %v3015_v27 = vmul.f32 0.03125, %v3010_v21  ;;  %v3021_v41 = vmul.f32 %v3017_v8, %v3017_v8  ;;  %v3022_v47 = vmul.f32 %v3018_v18, %v3018_v18 }
 0x6b9   :  { %v3019_v59 = vsub.f32 %v2998_v56, %v3015_v27  ;;  %v3027_v12 = vsel %vm140_vm0, %v3021_v41, 0.0  ;;  %v3030_v22 = vsel %vm140_vm0, %v3022_v47, 0.0 }
 0x6ba   :  { %3028 = vadd.xlane.f32.xlu0 %v3027_v12  ;;  %3031 = vadd.xlane.f32.xlu1 %v3030_v22 }
 0x6bb   :  { %v3023_v25 = vmul.f32 %v3019_v59, %v3019_v59 }
 0x6bd   :  { %v3033_v29 = vsel %vm140_vm0, %v3023_v25, 0.0 }
 0x6be   :  { %3034 = vadd.xlane.f32.xlu0 %v3033_v29 }
 0x73f   :  { %v3026_v49 = vpop.xlane.xlu1 %3025 }
 0x740   :  { %v3036_v46 = vmul.f32 0.03125, %v3026_v49 }
 0x742   :  { %v3040_v35 = vadd.f32 1e-05, %v3036_v46 }
 0x743   :  { %v3032_v15 = vpop.xlane.xlu1 %3031  ;;  %v3029_v50 = vpop.xlane.xlu0 %3028 }
 0x744   :  { %3641 = vrsqrt.f32 %v3040_v35  ;;  %v3038_v26 = vmul.f32 0.03125, %v3032_v15  ;;  %v3037_v37 = vmul.f32 0.03125, %v3029_v50 }
 0x746   :  { %v3042_v53 = vadd.f32 1e-05, %v3038_v26  ;;  %v3041_v30 = vadd.f32 1e-05, %v3037_v37 }
 0x747   :  { %v3035_v32 = vpop.xlane.xlu0 %3034 }
 0x748   :  { %3643 = vrsqrt.f32 %v3042_v53  ;;  %v3039_v5 = vmul.f32 0.03125, %v3035_v32 }
 0x749   :  { %3645 = vrsqrt.f32 %v3041_v30 }
 0x74a   :  { %v3043_v7 = vadd.f32 1e-05, %v3039_v5 }
 0x74c   :  { %3647 = vrsqrt.f32 %v3043_v7 }
 0x751   :  { %v3642_v24 = vpop.eup %3641 }
 0x752   :  { %v3048_v51 = vmul.f32 %v3642_v24, %v3016_v57 }
 0x754   :  { %v3056_v52 = vmul.f32 %v3055_v60, %v3048_v51 }
 0x755   :  { %v3644_v39 = vpop.eup %3643 }
 0x756   :  { %v3646_v63 = vpop.eup %3645  ;;  %v3064_v36 = vadd.f32 %v3063_v31, %v3056_v52  ;;  %v3050_v45 = vmul.f32 %v3644_v39, %v3018_v18 }
 0x757   :  { %v3049_v10 = vmul.f32 %v3646_v63, %v3017_v8 }
 0x758   :  { %3068 = vst.msk [vmem:[#allocation15] sm:$0xff] %vm140_vm0, %v3064_v36  ;;  %v3058_v62 = vmul.f32 %v3055_v60, %v3050_v45 }
 0x759   :  { %v3648_v16 = vpop.eup %3647  ;;  %v3057_v38 = vmul.f32 %v3055_v60, %v3049_v10 }
 0x75a   :  { %v3066_v43 = vadd.f32 %v3063_v31, %v3058_v62  ;;  %v3051_v13 = vmul.f32 %v3648_v16, %v3019_v59 }
 0x75b   :  { %v3065_v54 = vadd.f32 %v3063_v31, %v3057_v38 }
 0x75c   :  { %3070 = vst.msk [vmem:[#allocation15 + $0x10] sm:$0xff] %vm140_vm0, %v3066_v43  ;;  %v3059_v42 = vmul.f32 %v3055_v60, %v3051_v13 }
 0x75d   :  { %3069 = vst.msk [vmem:[#allocation15 + $0x8] sm:$0xff] %vm140_vm0, %v3065_v54 }
 0x75e   :  { %v3067_v23 = vadd.f32 %v3063_v31, %v3059_v42 }
 0x760   :  { %3071 = vst.msk [vmem:[#allocation15 + $0x18] sm:$0xff] %vm140_vm0, %v3067_v23 }
 0x761   :  { %3761 = shalt.err (!%p3758_p1)
}
 0x762   :  { %s3796_s7 = smov 128  }
 0x763   :  { %3083 = dma.vmem_to_hbm [thread:$0]  %s3078_s29, 512, %s4668_s6, [#allocation8], %s3796_s7, %s3796_s7, %s3792_s24  }
 0x764   :  { %3776 = dma.done.wait [#allocation8], 512  }
 0x765   :  { %3777 = vsyncadd [#allocation8], 4294966784 }
 0x766   :  { %3087 = vsyncpa [#allocation7], 1 }
 0x767   :  { %3088 = vsyncpa [#allocation10], 1 }
 0x768   :  { %3089 = vsyncpa [#allocation13], 1 }
 0x769   :  { %3090 = vsyncpa [#allocation8], 1 }

</bundles_post_ra>
